<compile_context>
chip_gen: v7x
topology: tpu7x:2x2x1
jax: 0.10.0
libtpu: 0.0.40
codegen_flags: <defaults>
</compile_context>

<pallas_src>
import math

import jax
import jax.numpy as jnp
from jax.experimental import pallas as pl
from jax.experimental.pallas import tpu as pltpu


def _make_kernel(inv_c, groups):
    """Kernel over a (tn, G*C) tile of G-grouped tokens."""

    def kernel(x_ref, s_ref, st_ref, w_ref, o_ref):
        x = x_ref[...].astype(jnp.float32)                        # (tn, G*C)
        s = s_ref[...]                                            # (G*C, G)

        # Per-token (segmented) sums of x and x^2 on the MXU (idle otherwise).
        s1 = jnp.dot(x, s, preferred_element_type=jnp.float32,
                     precision=jax.lax.Precision.HIGHEST)         # (tn, G)
        s2 = jnp.dot(x * x, s, preferred_element_type=jnp.float32,
                     precision=jax.lax.Precision.HIGHEST)         # (tn, G)

        mu = s1 * inv_c
        # One-pass biased variance, clamped to avoid rsqrt of a tiny negative.
        var = jnp.maximum(s2 * inv_c - mu * mu, 0.0)
        inv = jax.lax.rsqrt(var + 1e-5)                           # (tn, G)

        if groups == 1:
            scaled = x * inv                                      # lane broadcast
        else:
            # Expand 1/sigma back over each token's C lanes via the MXU.
            inv_e = jnp.dot(inv, st_ref[...],
                            preferred_element_type=jnp.float32,
                            precision=jax.lax.Precision.HIGHEST)  # (tn, G*C)
            scaled = x * inv_e

        o_ref[...] = (scaled * w_ref[...]).astype(o_ref.dtype)

    return kernel


def biasfree_layernorm(x, weight, *, target_block_bytes=4 * 1024 * 1024):
    """Bias-free LayerNorm over the last axis. x: (..., C), weight: (C,)."""
    orig_shape = x.shape
    C = orig_shape[-1]
    M = math.prod(orig_shape[:-1]) if len(orig_shape) > 1 else 1

    # ---- Lane-densify: pack G tokens per row so the last dim is 128-aligned.
    g = 128 // math.gcd(C, 128)
    if g > 1 and (M % g != 0):
        g = 1                      # fallback: correct, just lane-sparse
    gc = g * C
    mg = M // g

    x2 = x.reshape(mg, gc)         # free contiguous reshape

    # ---- Row-tile sized from the f32 working set (x upcast + x*x + output).
    rows = max(8, int(target_block_bytes) // (gc * 4))
    if mg <= rows:
        tn = mg                    # single full-extent tile (no 8-alignment needed)
        grid_n = 1
    else:
        tn_max = max(8, (rows // 8) * 8)
        tn = tn_max
        # Prefer a divisor of mg (no ragged last tile) if it costs < 2x steps;
        # otherwise rely on Pallas' masked edge block instead of padding.
        lower = max(8, tn_max // 2)
        for t in range(tn_max, lower - 1, -8):
            if mg % t == 0:
                tn = t
                break
        grid_n = pl.cdiv(mg, tn)

    # ---- Resident blocks: f32 weight (tiled G times) and segment matrices.
    w_f32 = jnp.tile(weight.astype(jnp.float32).reshape(-1), g).reshape(1, gc)
    seg = jnp.arange(gc, dtype=jnp.int32) // C
    s_mat = (seg[:, None] == jnp.arange(g, dtype=jnp.int32)[None, :]).astype(
        jnp.float32)                                  # (G*C, G) block-diag ones
    st_mat = jnp.transpose(s_mat)                     # (G, G*C)

    kernel = _make_kernel(1.0 / float(C), g)

    out = pl.pallas_call(
        kernel,
        out_shape=jax.ShapeDtypeStruct((mg, gc), x.dtype),
        grid_spec=pltpu.PrefetchScalarGridSpec(
            num_scalar_prefetch=0,
            grid=(grid_n,),
            in_specs=[
                # (tn, G*C) token tiles: tn is a multiple of 8 (or full dim),
                # G*C is the full last dim (and a multiple of 128 when g > 1).
                pl.BlockSpec((tn, gc), lambda i: (i, 0)),
                # Resident blocks (constant index_map -> DMA'd once).
                pl.BlockSpec((gc, g), lambda i: (0, 0)),
                pl.BlockSpec((g, gc), lambda i: (0, 0)),
                pl.BlockSpec((1, gc), lambda i: (0, 0)),
            ],
            out_specs=pl.BlockSpec((tn, gc), lambda i: (i, 0)),
        ),
        compiler_params=pltpu.CompilerParams(
            dimension_semantics=("parallel",),        # megacore / dual-TC split
            vmem_limit_bytes=48 * 1024 * 1024,        # safe on v5e/v6e/v7x
        ),
    )(x2, s_mat, st_mat, w_f32)

    return out.reshape(orig_shape)


def biasfree_layernorm_ref(x, weight):
    x = x.astype(jnp.float32)
    mu = jnp.mean(x, axis=-1, keepdims=True)
    var = jnp.mean((x - mu) ** 2, axis=-1, keepdims=True)
    return x / jnp.sqrt(var + 1e-5) * weight.astype(jnp.float32)


if __name__ == "__main__":
    key = jax.random.PRNGKey(0)
    k1, k2, k3, k4 = jax.random.split(key, 4)

    # Case 1: lane-dense channels (C multiple of 128) -> G = 1 path.
    B, N, C = 2, 64, 128
    x1 = jax.random.normal(k1, (B, N, C), dtype=jnp.float32)
    w1 = jnp.ones((C,), dtype=jnp.float32)
    out1 = jax.block_until_ready(biasfree_layernorm(x1, w1))
    ref1 = biasfree_layernorm_ref(x1, w1)
    assert out1.shape == (B, N, C)
    assert jnp.allclose(out1, ref1, atol=1e-4, rtol=1e-4)

    # Case 2: small Restormer-like C=48 -> grouped (G=8, 384 lanes) MXU path.
    B2, N2, C2 = 2, 60, 48
    x2 = jax.random.normal(k2, (B2, N2, C2), dtype=jnp.float32)
    w2 = jnp.ones((C2,), dtype=jnp.float32)
    out2 = jax.block_until_ready(biasfree_layernorm(x2, w2))
    ref2 = biasfree_layernorm_ref(x2, w2)
    assert out2.shape == (B2, N2, C2)
    assert jnp.allclose(out2, ref2, atol=1e-4, rtol=1e-4)

    # Case 3: bf16 I/O, C=96 -> grouped (G=4) path, f32 math inside.
    B3, N3, C3 = 2, 64, 96
    x3 = jax.random.normal(k3, (B3, N3, C3), dtype=jnp.float32).astype(jnp.bfloat16)
    w3 = jnp.ones((C3,), dtype=jnp.float32)
    out3 = jax.block_until_ready(biasfree_layernorm(x3, w3))
    ref3 = biasfree_layernorm_ref(x3, w3)
    assert out3.shape == (B3, N3, C3)
    assert jnp.allclose(out3.astype(jnp.float32), ref3, atol=5e-2, rtol=5e-2)

    # Case 4: multi-tile grid with a ragged last tile (203 rows, tn=64) ->
    # exercises the no-pad edge-block path.
    B4, N4, C4 = 1, 203, 128
    x4 = jax.random.normal(k4, (B4, N4, C4), dtype=jnp.float32)
    w4 = jnp.ones((C4,), dtype=jnp.float32)
    out4 = jax.block_until_ready(
        biasfree_layernorm(x4, w4, target_block_bytes=32 * 1024))
    ref4 = biasfree_layernorm_ref(x4, w4)
    assert out4.shape == (B4, N4, C4)
    assert jnp.allclose(out4, ref4, atol=1e-4, rtol=1e-4)

    print("KERNEL_OK")
</pallas_src>

<mosaic_0001>
module attributes {stable_mosaic.version = 11 : i64} {
  func.func @kernel(%arg0: i32, %arg1: memref<128x128xf32, #tpu.memory_space<vmem>>, %arg2: memref<128x1xf32, #tpu.memory_space<vmem>>, %arg3: memref<1x128xf32, #tpu.memory_space<vmem>>, %arg4: memref<1x128xf32, #tpu.memory_space<vmem>>, %arg5: memref<128x128xf32, #tpu.memory_space<vmem>>) attributes {dimension_semantics = [#tpu.dimension_semantics<parallel>], iteration_bounds = array<i64: 1>, scalar_prefetch = 0 : i64, scratch_operands = 0 : i64, tpu.core_type = #tpu.core_type<tc>, window_params = [{transform_indices = @transform_0, window_bounds = array<i64: 128, 128>}, {pipeline_mode = #tpu.pipeline_mode<synchronous>, transform_indices = @transform_1, window_bounds = array<i64: 128, 1>}, {pipeline_mode = #tpu.pipeline_mode<synchronous>, transform_indices = @transform_2, window_bounds = array<i64: 1, 128>}, {pipeline_mode = #tpu.pipeline_mode<synchronous>, transform_indices = @transform_3, window_bounds = array<i64: 1, 128>}, {transform_indices = @transform_4, window_bounds = array<i64: 128, 128>}]} {
    %c0 = arith.constant 0 : index
    %c0_0 = arith.constant 0 : index
    %0 = vector.load %arg1[%c0, %c0_0] : memref<128x128xf32, #tpu.memory_space<vmem>>, vector<128x128xf32>
    %c0_1 = arith.constant 0 : index
    %c0_2 = arith.constant 0 : index
    %1 = vector.load %arg2[%c0_1, %c0_2] : memref<128x1xf32, #tpu.memory_space<vmem>>, vector<128x1xf32>
    %cst = arith.constant dense<0.000000e+00> : vector<128x1xf32>
    %2 = tpu.matmul %0, %1, %cst {dimension_numbers = #tpu.dot_dimension_numbers<[1], [0], [0], [1], [0, 0, 1, 1], [], []>, precision = #tpu.contract_precision<fp32>} : vector<128x128xf32>, vector<128x1xf32>, vector<128x1xf32> -> vector<128x1xf32>
    %3 = arith.mulf %0, %0 : vector<128x128xf32>
    %cst_3 = arith.constant dense<0.000000e+00> : vector<128x1xf32>
    %4 = tpu.matmul %3, %1, %cst_3 {dimension_numbers = #tpu.dot_dimension_numbers<[1], [0], [0], [1], [0, 0, 1, 1], [], []>, precision = #tpu.contract_precision<fp32>} : vector<128x128xf32>, vector<128x1xf32>, vector<128x1xf32> -> vector<128x1xf32>
    %cst_4 = arith.constant 7.812500e-03 : f32
    %5 = vector.broadcast %cst_4 : f32 to vector<128x1xf32>
    %6 = arith.mulf %2, %5 : vector<128x1xf32>
    %cst_5 = arith.constant 7.812500e-03 : f32
    %7 = vector.broadcast %cst_5 : f32 to vector<128x1xf32>
    %8 = arith.mulf %4, %7 : vector<128x1xf32>
    %9 = arith.mulf %6, %6 : vector<128x1xf32>
    %10 = arith.subf %8, %9 : vector<128x1xf32>
    %cst_6 = arith.constant 0.000000e+00 : f32
    %11 = vector.broadcast %cst_6 : f32 to vector<128x1xf32>
    %12 = arith.maximumf %10, %11 : vector<128x1xf32>
    %cst_7 = arith.constant 9.99999974E-6 : f32
    %13 = vector.broadcast %cst_7 : f32 to vector<128x1xf32>
    %14 = arith.addf %12, %13 : vector<128x1xf32>
    %15 = math.rsqrt %14 : vector<128x1xf32>
    %16 = vector.broadcast %15 : vector<128x1xf32> to vector<128x128xf32>
    %17 = arith.mulf %0, %16 : vector<128x128xf32>
    %c0_8 = arith.constant 0 : index
    %c0_9 = arith.constant 0 : index
    %18 = vector.load %arg4[%c0_8, %c0_9] : memref<1x128xf32, #tpu.memory_space<vmem>>, vector<1x128xf32>
    %19 = vector.broadcast %18 : vector<1x128xf32> to vector<128x128xf32>
    %20 = arith.mulf %17, %19 : vector<128x128xf32>
    %c0_10 = arith.constant 0 : index
    %c0_11 = arith.constant 0 : index
    %21 = vector.load %arg5[%c0_10, %c0_11] : memref<128x128xf32, #tpu.memory_space<vmem>>, vector<128x128xf32>
    tpu.vector_store %arg5[%c0_10, %c0_11], %20 {strides = array<i32>} : memref<128x128xf32, #tpu.memory_space<vmem>>, vector<128x128xf32>,
    return
  }
  func.func @transform_0(%arg0: i32) -> (i32, i32) {
    %c0_i32 = arith.constant 0 : i32
    %c0_i32_0 = arith.constant 0 : i32
    return %arg0, %c0_i32 : i32, i32
  }
  func.func @transform_1(%arg0: i32) -> (i32, i32) {
    %c0_i32 = arith.constant 0 : i32
    %c0_i32_0 = arith.constant 0 : i32
    %c0_i32_1 = arith.constant 0 : i32
    return %c0_i32, %c0_i32_0 : i32, i32
  }
  func.func @transform_2(%arg0: i32) -> (i32, i32) {
    %c0_i32 = arith.constant 0 : i32
    %c0_i32_0 = arith.constant 0 : i32
    %c0_i32_1 = arith.constant 0 : i32
    return %c0_i32, %c0_i32_0 : i32, i32
  }
  func.func @transform_3(%arg0: i32) -> (i32, i32) {
    %c0_i32 = arith.constant 0 : i32
    %c0_i32_0 = arith.constant 0 : i32
    %c0_i32_1 = arith.constant 0 : i32
    return %c0_i32, %c0_i32_0 : i32, i32
  }
  func.func @transform_4(%arg0: i32) -> (i32, i32) {
    %c0_i32 = arith.constant 0 : i32
    %c0_i32_0 = arith.constant 0 : i32
    return %arg0, %c0_i32 : i32, i32
  }
}

</mosaic_0001>

<bundles_post_ra>
// kernel: tpu_custom_call.1
= control target key start
LH: loop header
LB: loop body
LE: loop exit
PB: predicated region body
PF: predicated region fallthrough
CT: control target
= control target key end

     0   :  { %s5759_s0 = inlined_call_operand.vmem [shape: f32[128,128], index: 0, kind: input, shape index: {}]   ;;  %s5760_s1 = inlined_call_operand.vmem [shape: f32[128,1], index: 1, kind: input, shape index: {}]   ;;  %s5761_s2 = inlined_call_operand.vmem [shape: f32[1,128], index: 2, kind: input, shape index: {}]   ;;  %s5762_s3 = inlined_call_operand.vmem [shape: f32[1,128], index: 3, kind: input, shape index: {}]   ;;  %s5763_s4 = inlined_call_operand.hbm [shape: f32[128,128], index: 4, kind: output, shape index: {}]  }
   0x1   :  { %v34_v0 = vld [vmem:[%s5760_s1] sm:$0xff]  ;;  %v35_v1 = vld [vmem:[%s5760_s1 + $0x8] sm:$0xff]  ;;  %v4618_v2 = vld [vmem:[%s5760_s1 + $0x10] sm:$0xff] }
   0x2   :  { %v51_v3 = vand.u32 4294901760, %v34_v0  ;;  %v54_v4 = vand.u32 4294901760, %v35_v1  ;;  %v4623_v5 = vld [vmem:[%s5760_s1 + $0x18] sm:$0xff]  ;;  %v57_v6 = vand.u32 4294901760, %v4618_v2  ;;  %v4629_v7 = vld [vmem:[%s5760_s1 + $0x20] sm:$0xff]  ;;  %v4634_v8 = vld [vmem:[%s5760_s1 + $0x28] sm:$0xff] }
   0x3   :  { %v60_v9 = vand.u32 4294901760, %v4623_v5  ;;  %v63_v10 = vand.u32 4294901760, %v4629_v7  ;;  %v66_v11 = vand.u32 4294901760, %v4634_v8  ;;  %v4642_v12 = vld [vmem:[%s5760_s1 + $0x30] sm:$0xff]  ;;  %v4647_v13 = vld [vmem:[%s5760_s1 + $0x38] sm:$0xff]  ;;  %v4652_v14 = vld [vmem:[%s5760_s1 + $0x40] sm:$0xff] }
   0x4   :  { %v4654_v15 = vpack.c.bf16 %v54_v4, %v51_v3  ;;  %v5784_v16 = vand.u32 4294901760, %v4642_v12  ;;  %v5782_v17 = vand.u32 4294901760, %v4647_v13  ;;  %v4661_v18 = vld [vmem:[%s5760_s1 + $0x48] sm:$0xff]  ;;  %v5780_v19 = vand.u32 4294901760, %v4652_v14  ;;  %v4667_v20 = vld [vmem:[%s5760_s1 + $0x50] sm:$0xff]  ;;  %v4672_v21 = vld [vmem:[%s5760_s1 + $0x58] sm:$0xff] }
   0x5   :  { %v4678_v22 = vpack.c.bf16 %v60_v9, %v57_v6  ;;  %v4684_v23 = vpack.c.bf16 %v66_v11, %v63_v10  ;;  %v5778_v24 = vand.u32 4294901760, %v4661_v18  ;;  %v5777_v25 = vand.u32 4294901760, %v4667_v20  ;;  %v4691_v26 = vld [vmem:[%s5760_s1 + $0x60] sm:$0xff]  ;;  %v4696_v27 = vld [vmem:[%s5760_s1 + $0x68] sm:$0xff]  ;;  %v4701_v28 = vld [vmem:[%s5760_s1 + $0x70] sm:$0xff] }
   0x6   :  { %5922 = vst [vmem:[#allocation5_spill] sm:$0xff] %v4654_v15  ;;  %3959 = vmatprep.subr.bf16.mxu0 %v4654_v15  ;;  %4151 = vmatprep.subr.bf16.mxu1 %v4654_v15  ;;  %v4709_v29 = vpack.c.bf16 %v5782_v17, %v5784_v16  ;;  %v5776_v30 = vand.u32 4294901760, %v4672_v21  ;;  %v5775_v31 = vand.u32 4294901760, %v4691_v26  ;;  %v5773_v32 = vand.u32 4294901760, %v4696_v27  ;;  %v4717_v33 = vld [vmem:[%s5760_s1 + $0x78] sm:$0xff]  ;;  %v18_v34 = vld [vmem:[%s5759_s0] sm:$0xff] }
   0x7   :  { %5923 = vst [vmem:[#allocation6_spill] sm:$0xff] %v4678_v22  ;;  %5924 = vst [vmem:[#allocation7_spill] sm:$0xff] %v4684_v23  ;;  %3961 = vmatpush3.bf16.msra.mxu0 %v4654_v15  ;;  %4153 = vmatpush3.bf16.msra.mxu1 %v4654_v15  ;;  %v4728_v35 = vpack.c.bf16 %v5778_v24, %v5780_v19  ;;  %v5772_v36 = vand.u32 4294901760, %v4701_v28  ;;  %v5770_v37 = vand.u32 4294901760, %v4717_v33  ;;  %v4732_v38 = vand.u32 4294901760, %v18_v34  ;;  %v19_v39 = vld [vmem:[%s5759_s0 + $0x8] sm:$0xff] }
   0x8   :  { %5925 = vst [vmem:[#allocation8_spill] sm:$0xff] %v4709_v29  ;;  %3963 = vmatprep.subr.bf16.mxu0 %v4678_v22  ;;  %4155 = vmatprep.subr.bf16.mxu1 %v4678_v22  ;;  %v4743_v40 = vpack.c.bf16 %v5776_v30, %v5777_v25  ;;  %v4749_v41 = vpack.c.bf16 %v5773_v32, %v5775_v31  ;;  %v4751_v43 = vand.u32 4294901760, %v19_v39  ;;  %v20_v44 = vld [vmem:[%s5759_s0 + $0x10] sm:$0xff] }
   0x9   :  { %5926 = vst [vmem:[#allocation9_spill] sm:$0xff] %v4728_v35  ;;  %v1336_v42 = vmul.f32 %v18_v34, %v18_v34  ;;  %v4760_v45 = vpack.c.bf16 %v5770_v37, %v5772_v36  ;;  %v4763_v46 = vsub.f32 %v18_v34, %v4732_v38  ;;  %v4765_v47 = vsub.f32 %v34_v0, %v51_v3 }
   0xa   :  { %5927 = vst [vmem:[#allocation10_spill] sm:$0xff] %v4743_v40  ;;  %5928 = vst [vmem:[#allocation11_spill] sm:$0xff] %v4749_v41  ;;  %v4767_v48 = vsub.f32 %v35_v1, %v54_v4  ;;  %v4772_v50 = vsub.f32 %v19_v39, %v4751_v43  ;;  %v1337_v51 = vmul.f32 %v19_v39, %v19_v39  ;;  %v4774_v52 = vand.u32 4294901760, %v20_v44 }
   0xb   :  { %5929 = vst [vmem:[#allocation12_spill] sm:$0xff] %v4760_v45  ;;  %5930 = vst [vmem:[#allocation13_spill] sm:$0xff] %v4763_v46  ;;  %v4769_v49 = vand.u32 4294901760, %v1336_v42  ;;  %3965 = vmatpush3.bf16.msra.mxu0 %v4678_v22  ;;  %4157 = vmatpush3.bf16.msra.mxu1 %v4678_v22  ;;  %v5764_v53 = vand.u32 4294901760, %v4763_v46  ;;  %v5767_v54 = vand.u32 4294901760, %v4765_v47  ;;  %v1338_v56 = vmul.f32 %v20_v44, %v20_v44 }
   0xc   :  { %5931 = vst [vmem:[#allocation14_spill] sm:$0xff] %v4772_v50  ;;  %v5766_v55 = vand.u32 4294901760, %v4767_v48  ;;  %3967 = vmatprep.subr.bf16.mxu0 %v4684_v23  ;;  %4159 = vmatprep.subr.bf16.mxu1 %v4684_v23  ;;  %v5765_v58 = vand.u32 4294901760, %v4772_v50  ;;  %v4787_v59 = vand.u32 4294901760, %v1337_v51  ;;  %v4790_v60 = vsub.f32 %v20_v44, %v4774_v52 }
   0xd   :  { %v4784_v57 = vsub.f32 %v1336_v42, %v4769_v49 }
   0xe   :  { %5933 = vst [vmem:[#allocation16_spill] sm:$0xff] %v4790_v60 }
   0xf   :  { %5932 = vst [vmem:[#allocation15_spill] sm:$0xff] %v4784_v57 }
  0x10   :  { %9 = vsyncpa [#allocation3], 0  ;;  %v134_v61 = vsub.f32 %v4763_v46, %v5764_v53  ;;  %v295_v62 = vsub.f32 %v4765_v47, %v5767_v54  ;;  %v302_v63 = vsub.f32 %v4767_v48, %v5766_v55  ;;  %v4801_v0 = vand.u32 4294901760, %v1338_v56  ;;  %3969 = vmatpush3.bf16.msra.mxu0 %v4684_v23  ;;  %4161 = vmatpush3.bf16.msra.mxu1 %v4684_v23  ;;  %v23_v25 = vld [vmem:[%s5759_s0 + $0x28] sm:$0xff]  ;;  %s4581_s25 = smov [#allocation2]  }
  0x11   :  { %v5768_v1 = vand.u32 4294901760, %v4784_v57  ;;  %v4807_v3 = vsub.f32 %v4772_v50, %v5765_v58  ;;  %v4810_v4 = vsub.f32 %v1337_v51, %v4787_v59  ;;  %v5769_v34 = vand.u32 4294901760, %v4790_v60  ;;  %3971 = vmatprep.subr.bf16.mxu0 %v4709_v29  ;;  %4163 = vmatprep.subr.bf16.mxu1 %v4709_v29  ;;  %s2890_s26 = sshll.u32 %s4581_s25, 4  ;;  %s2891_s26 = int_to_ptr.vmem [resolvable:$true] %s2890_s26 }
  0x12   :  { %v135_v39 = vand.u32 4294901760, %v134_v61  ;;  %v296_v42 = vand.u32 4294901760, %v295_v62  ;;  %v303_v44 = vand.u32 4294901760, %v302_v63  ;;  %v4816_v53 = vsub.f32 %v1338_v56, %v4801_v0  ;;  %v21_v56 = vld [vmem:[%s5759_s0 + $0x18] sm:$0xff]  ;;  %s4556_s29 = scalar_lea.vmem %s2891_s26, 2048  ;;  %p4561_p1 = scmp.lt.s32.totalorder %s2891_s26, %s2891_s26 }
  0x13   :  { %5934 = vst [vmem:[#allocation17_spill] sm:$0xff] %v4810_v4  ;;  %v1436_v51 = vsub.f32 %v4784_v57, %v5768_v1  ;;  %v5771_v55 = vand.u32 4294901760, %v4810_v4  ;;  %v4828_v61 = vsub.f32 %v4790_v60, %v5769_v34  ;;  %v4836_v54 = vand.u32 4294901760, %v21_v56  ;;  %v22_v34 = vld [vmem:[%s5759_s0 + $0x20] sm:$0xff]  ;;  %p4557_p0 = scmp.ne.s32.totalorder %s2891_s26, %s4556_s29  ;;  %p4562_p2 = scmp.lt.s32.totalorder %s4556_s29, %s4556_s29 }
  0x14   :  { %5935 = vst [vmem:[#allocation18_spill] sm:$0xff] %v4816_v53  ;;  %3318 = vmatprep.mubr.f32.mxu0 %v135_v39  ;;  %v4833_v62 = vpack.c.bf16 %v303_v44, %v296_v42  ;;  %v5774_v63 = vand.u32 4294901760, %v4816_v53  ;;  %v4841_v1 = vsub.f32 %v4618_v2, %v57_v6  ;;  %v4855_v44 = vsub.f32 %v4623_v5, %v60_v9 }
  0x15   :  { %v1437_v37 = vand.u32 4294901760, %v1436_v51  ;;  %v4849_v39 = vsub.f32 %v4810_v4, %v5771_v55  ;;  %3973 = vmatpush3.bf16.msra.mxu0 %v4709_v29  ;;  %4165 = vmatpush3.bf16.msra.mxu1 %v4709_v29  ;;  %v4865_v6 = vsub.f32 %v21_v56, %v4836_v54  ;;  %v1339_v55 = vmul.f32 %v21_v56, %v21_v56  ;;  %p4563_p3 = por %p4562_p2, %p4561_p1 }
  0x16   :  { %v4862_v2 = vsub.f32 %v4816_v53, %v5774_v63  ;;  %v5779_v51 = vand.u32 4294901760, %v4841_v1  ;;  %3975 = vmatprep.subr.bf16.mxu0 %v4728_v35  ;;  %4167 = vmatprep.subr.bf16.mxu1 %v4728_v35  ;;  %v5781_v9 = vand.u32 4294901760, %v4855_v44  ;;  %v4872_v36 = vand.u32 4294901760, %v22_v34 }
  0x17   :  { %5936 = vst [vmem:[#allocation19_spill] sm:$0xff] %v4865_v6  ;;  %v1340_v32 = vmul.f32 %v22_v34, %v22_v34  ;;  %3654 = vmatprep.mubr.f32.mxu1 %v1437_v37  ;;  %v5783_v31 = vand.u32 4294901760, %v4865_v6  ;;  %v4879_v30 = vand.u32 4294901760, %v1339_v55  ;;  %v4892_v42 = vand.u32 4294901760, %v23_v25  ;;  %p4564_p4 = pnand %p4563_p3, %p4557_p0 }
  0x18   :  { %v309_v56 = vsub.f32 %v4841_v1, %v5779_v51  ;;  %v316_v24 = vsub.f32 %v4855_v44, %v5781_v9  ;;  %v4888_v37 = vsub.f32 %v22_v34, %v4872_v36  ;;  %v4907_v34 = vsub.f32 %v4629_v7, %v63_v10 }
  0x19   :  { %v4890_v63 = vand.u32 4294901760, %v1340_v32  ;;  %3977 = vmatpush3.bf16.msra.mxu0 %v4728_v35  ;;  %4169 = vmatpush3.bf16.msra.mxu1 %v4728_v35  ;;  %v4899_v51 = vsub.f32 %v4865_v6, %v5783_v31  ;;  %v4902_v5 = vsub.f32 %v1339_v55, %v4879_v30  ;;  %v4924_v10 = vsub.f32 %v4634_v8, %v66_v11 }
  0x1a   :  { %5937 = vst [vmem:[#allocation20_spill] sm:$0xff] %v4888_v37  ;;  %v310_v19 = vand.u32 4294901760, %v309_v56  ;;  %3979 = vmatprep.subr.bf16.mxu0 %v4743_v40  ;;  %4171 = vmatprep.subr.bf16.mxu1 %v4743_v40  ;;  %v317_v9 = vand.u32 4294901760, %v316_v24  ;;  %v5785_v58 = vand.u32 4294901760, %v4888_v37  ;;  %v4916_v56 = vsub.f32 %v23_v25, %v4892_v42 }
  0x1b   :  { %5938 = vst [vmem:[#allocation21_spill] sm:$0xff] %v4902_v5  ;;  %v4913_v17 = vsub.f32 %v1340_v32, %v4890_v63  ;;  %v5786_v31 = vand.u32 4294901760, %v4902_v5  ;;  %v5787_v7 = vand.u32 4294901760, %v4907_v34  ;;  %v5942_v29 = vand.u32 4294901760, %v4924_v10 }
  0x1c   :  { %5940 = vst [vmem:[#allocation23_spill] sm:$0xff] %v4916_v56  ;;  %v4926_v24 = vpack.c.bf16 %v317_v9, %v310_v19  ;;  %v4931_v32 = vsub.f32 %v4888_v37, %v5785_v58  ;;  %v1341_v9 = vmul.f32 %v23_v25, %v23_v25  ;;  %v24_v58 = vld [vmem:[%s5759_s0 + $0x30] sm:$0xff]  ;;  %v5945_v37 = vand.u32 4294901760, %v4642_v12 }
  0x1d   :  { %5939 = vst [vmem:[#allocation22_spill] sm:$0xff] %v4913_v17  ;;  %v5796_v16 = vand.u32 4294901760, %v4913_v17  ;;  %3981 = vmatpush3.bf16.msra.mxu0 %v4743_v40  ;;  %4173 = vmatpush3.bf16.msra.mxu1 %v4743_v40  ;;  %v4940_v8 = vsub.f32 %v4902_v5, %v5786_v31  ;;  %v323_v11 = vsub.f32 %v4907_v34, %v5787_v7  ;;  %v5941_v7 = vand.u32 4294901760, %v4916_v56 }
  0x1e   :  { %3983 = vmatprep.subr.bf16.mxu0 %v4749_v41  ;;  %4175 = vmatprep.subr.bf16.mxu1 %v4749_v41  ;;  %v4962_v25 = vand.u32 4294901760, %v24_v58  ;;  %v330_v23 = vsub.f32 %v4924_v10, %v5942_v29  ;;  %v4968_v55 = vand.u32 4294901760, %v1341_v9  ;;  %v1342_v5 = vmul.f32 %v24_v58, %v24_v58 }
  0x1f   :  { %v4955_v31 = vsub.f32 %v4913_v17, %v5796_v16  ;;  %v4960_v19 = vsub.f32 %v4916_v56, %v5941_v7  ;;  %v324_v35 = vand.u32 4294901760, %v323_v11  ;;  %v25_v16 = vld [vmem:[%s5759_s0 + $0x38] sm:$0xff]  ;;  %v4988_v17 = vsub.f32 %v4642_v12, %v5945_v37 }
  0x20   :  { %v4976_v56 = vsub.f32 %v24_v58, %v4962_v25  ;;  %v331_v11 = vand.u32 4294901760, %v330_v23  ;;  %v4981_v29 = vsub.f32 %v1341_v9, %v4968_v55  ;;  %v4983_v40 = vand.u32 4294901760, %v25_v16 }
  0x21   :  { %3985 = vmatpush3.bf16.msra.mxu0 %v4749_v41  ;;  %4177 = vmatpush3.bf16.msra.mxu1 %v4749_v41  ;;  %v4993_v7 = vand.u32 4294901760, %v1342_v5  ;;  %v5946_v23 = vand.u32 4294901760, %v4647_v13  ;;  %v1343_v41 = vmul.f32 %v25_v16, %v25_v16  ;;  %v5823_v37 = vand.u32 4294901760, %v4988_v17 }
  0x22   :  { %5943 = vst [vmem:[#allocation24_spill] sm:$0xff] %v4976_v56  ;;  %5944 = vst [vmem:[#allocation25_spill] sm:$0xff] %v4981_v29  ;;  %3987 = vmatprep.subr.bf16.mxu0 %v4760_v45  ;;  %4179 = vmatprep.subr.bf16.mxu1 %v4760_v45  ;;  %v5815_v58 = vand.u32 4294901760, %v4976_v56  ;;  %v5000_v6 = vpack.c.bf16 %v331_v11, %v324_v35  ;;  %v5820_v53 = vand.u32 4294901760, %v4981_v29  ;;  %v26_v35 = vld [vmem:[%s5759_s0 + $0x40] sm:$0xff] }
  0x23   :  { %v4998_v9 = vsub.f32 %v4647_v13, %v5946_v23  ;;  %v5004_v12 = vsub.f32 %v25_v16, %v4983_v40  ;;  %v5013_v4 = vsub.f32 %v1342_v5, %v4993_v7  ;;  %v5016_v23 = vand.u32 4294901760, %v1343_v41 }
  0x24   :  { %v5010_v22 = vsub.f32 %v4976_v56, %v5815_v58  ;;  %v5026_v16 = vsub.f32 %v4981_v29, %v5820_v53  ;;  %v337_v11 = vsub.f32 %v4988_v17, %v5823_v37  ;;  %v5032_v58 = vand.u32 4294901760, %v26_v35 }
  0x25   :  { %5947 = vst [vmem:[#allocation26_spill] sm:$0xff] %v5004_v12  ;;  %5948 = vst [vmem:[#allocation27_spill] sm:$0xff] %v5013_v4  ;;  %3989 = vmatpush3.bf16.msra.mxu0 %v4760_v45  ;;  %4181 = vmatpush3.bf16.msra.mxu1 %v4760_v45  ;;  %v5951_v56 = vand.u32 4294901760, %v4998_v9  ;;  %v5042_v5 = vsub.f32 %v1343_v41, %v5016_v23  ;;  %v5953_v37 = vand.u32 4294901760, %v5004_v12  ;;  %v5955_v13 = vand.u32 4294901760, %v4807_v3 }
  0x26   :  { %5949 = vst [vmem:[#allocation28_spill] sm:$0xff] %v5016_v23  ;;  %5950 = vst [vmem:[#allocation29_spill] sm:$0xff] %v5032_v58  ;;  %3991 = vmatprep.subr.bf16.mxu0 %v4833_v62  ;;  %4183 = vmatprep.subr.bf16.mxu1 %v4833_v62  ;;  %v1487_v29 = vand.u32 4294901760, %v5026_v16  ;;  %v338_v50 = vand.u32 4294901760, %v337_v11  ;;  %v5051_v57 = vsub.f32 %v26_v35, %v5032_v58  ;;  %v5956_v45 = vand.u32 4294901760, %v4849_v39 }
  0x27   :  { %v344_v53 = vsub.f32 %v4998_v9, %v5951_v56  ;;  %5952 = vst [vmem:[#allocation30_spill] sm:$0xff] %v5042_v5  ;;  %v5048_v60 = vsub.f32 %v5004_v12, %v5953_v37  ;;  %v5957_v41 = vand.u32 4294901760, %v5013_v4  ;;  %v1344_v46 = vmul.f32 %v26_v35, %v26_v35  ;;  %v27_v37 = vld [vmem:[%s5759_s0 + $0x48] sm:$0xff] }
  0x28   :  { %5954 = vst [vmem:[#allocation31_spill] sm:$0xff] %v5051_v57  ;;  %3319 = vmatmul.mubr.f32.vlgmr.msra.gmra.mrb[0].mxu0 %v5955_v13  ;;  %3655 = vmatmul.mubr.f32.vlgmr.msra.gmra.mrb[0].mxu1 %v5956_v45  ;;  %v5068_v39 = vand.u32 4294901760, %v27_v37  ;;  %v5959_v13 = vand.u32 4294901760, %v4652_v14  ;;  %v5960_v35 = vand.u32 4294901760, %v4828_v61  ;;  %v5961_v11 = vand.u32 4294901760, %v4862_v2 }
  0x29   :  { %v1496_v56 = vsub.f32 %v5013_v4, %v5957_v41  ;;  %v345_v16 = vand.u32 4294901760, %v344_v53  ;;  %3993 = vmatpush3.bf16.msra.mxu0 %v4833_v62  ;;  %4185 = vmatpush3.bf16.msra.mxu1 %v4833_v62  ;;  %v5962_v62 = vand.u32 4294901760, %v5042_v5  ;;  %v5084_v45 = vand.u32 4294901760, %v1344_v46 }
  0x2a   :  { %5958 = vst [vmem:[#allocation32_spill] sm:$0xff] %v5068_v39  ;;  %v5073_v53 = vsub.f32 %v4652_v14, %v5959_v13  ;;  %3321 = vmatprep.mubr.f32.mxu0 %v5960_v35  ;;  %3657 = vmatprep.mubr.f32.mxu1 %v5961_v11  ;;  %v5964_v14 = vand.u32 4294901760, %v5051_v57  ;;  %v5094_v2 = vsub.f32 %v27_v37, %v5068_v39  ;;  %v28_v13 = vld [vmem:[%s5759_s0 + $0x50] sm:$0xff]  ;;  %v5967_v35 = vand.u32 4294901760, %v4899_v51 }
  0x2b   :  { %v1497_v41 = vand.u32 4294901760, %v1496_v56  ;;  %v5079_v15 = vpack.c.bf16 %v345_v16, %v338_v50  ;;  %v1506_v3 = vsub.f32 %v5042_v5, %v5962_v62  ;;  %5963 = vst [vmem:[#allocation33_spill] sm:$0xff] %v5084_v45  ;;  %3995 = vmatprep.subr.bf16.mxu0 %v4926_v24  ;;  %4187 = vmatprep.subr.bf16.mxu1 %v4926_v24  ;;  %v5966_v56 = vand.u32 4294901760, %v4661_v18 }
  0x2c   :  { %v5091_v61 = vsub.f32 %v5051_v57, %v5964_v14  ;;  %5965 = vst [vmem:[#allocation34_spill] sm:$0xff] %v5094_v2  ;;  %3322 = vmatmul.mubr.f32.gmra.mrb[2].mxu0 %v5967_v35  ;;  %v5968_v11 = vand.u32 4294901760, %v4940_v8  ;;  %v5110_v14 = vsub.f32 %v1344_v46, %v5084_v45  ;;  %v1345_v50 = vmul.f32 %v27_v37, %v27_v37 }
  0x2d   :  { %v5100_v16 = vsub.f32 %v4661_v18, %v5966_v56  ;;  %v1507_v62 = vand.u32 4294901760, %v1506_v3  ;;  %v5112_v5 = vand.u32 4294901760, %v28_v13  ;;  %3997 = vmatpush3.bf16.msra.mxu0 %v4926_v24  ;;  %4189 = vmatpush3.bf16.msra.mxu1 %v4926_v24  ;;  %v5840_v56 = vand.u32 4294901760, %v5094_v2 }
  0x2e   :  { %3658 = vmatmul.mubr.f32.gmra.mrb[2].mxu1 %v5968_v11  ;;  %5969 = vst [vmem:[#allocation35_spill] sm:$0xff] %v5110_v14  ;;  %v215_v18 = vand.u32 4294901760, %v5091_v61  ;;  %v5971_v51 = vand.u32 4294901760, %v5073_v53  ;;  %v5972_v46 = vand.u32 4294901760, %v4931_v32  ;;  %v5973_v37 = vand.u32 4294901760, %v4955_v31  ;;  %3999 = vmatprep.subr.bf16.mxu0 %v5000_v6 }
  0x2f   :  { %5970 = vst [vmem:[#allocation36_spill] sm:$0xff] %v5112_v5  ;;  %v5841_v3 = vand.u32 4294901760, %v5100_v16  ;;  %v5844_v35 = vand.u32 4294901760, %v5110_v14  ;;  %v5127_v11 = vand.u32 4294901760, %v1345_v50  ;;  %v5130_v24 = vsub.f32 %v28_v13, %v5112_v5  ;;  %4191 = vmatprep.subr.bf16.mxu1 %v5000_v6 }
  0x30   :  { %v351_v8 = vsub.f32 %v5073_v53, %v5971_v51  ;;  %3324 = vmatprep.mubr.f32.mxu0 %v5972_v46  ;;  %3660 = vmatprep.mubr.f32.mxu1 %v5973_v37  ;;  %v1346_v61 = vmul.f32 %v28_v13, %v28_v13  ;;  %v29_v51 = vld [vmem:[%s5759_s0 + $0x58] sm:$0xff]  ;;  %v224_v31 = vsub.f32 %v5094_v2, %v5840_v56  ;;  %v5977_v13 = vand.u32 4294901760, %v4960_v19 }
  0x31   :  { %5974 = vst [vmem:[#allocation37_spill] sm:$0xff] %v5127_v11  ;;  %5975 = vst [vmem:[#allocation38_spill] sm:$0xff] %v5130_v24  ;;  %v358_v46 = vsub.f32 %v5100_v16, %v5841_v3  ;;  %v5143_v37 = vand.u32 4294901760, %v29_v51  ;;  %v1516_v57 = vsub.f32 %v5110_v14, %v5844_v35  ;;  %v5151_v12 = vsub.f32 %v1345_v50, %v5127_v11 }
  0x32   :  { %v352_v32 = vand.u32 4294901760, %v351_v8  ;;  %3325 = vmatmul.mubr.f32.gmra.mrb[4].mxu0 %v5977_v13  ;;  %3661 = vmatmul.mubr.f32.gmra.mrb[4].mxu1 %v1487_v29  ;;  %v5154_v8 = vand.u32 4294901760, %v1346_v61  ;;  %v225_v3 = vand.u32 4294901760, %v224_v31  ;;  %v5981_v29 = vand.u32 4294901760, %v4667_v20 }
  0x33   :  { %5976 = vst [vmem:[#allocation39_spill] sm:$0xff] %v5143_v37  ;;  %5978 = vst [vmem:[#allocation40_spill] sm:$0xff] %v5151_v12  ;;  %4001 = vmatpush3.bf16.msra.mxu0 %v5000_v6  ;;  %4193 = vmatpush3.bf16.msra.mxu1 %v5000_v6  ;;  %v359_v2 = vand.u32 4294901760, %v358_v46  ;;  %v5159_v19 = vsub.f32 %v29_v51, %v5143_v37  ;;  %v5982_v50 = vand.u32 4294901760, %v5010_v22  ;;  %v1517_v35 = vand.u32 4294901760, %v1516_v57 }
  0x34   :  { %5979 = vst [vmem:[#allocation41_spill] sm:$0xff] %v5154_v8  ;;  %v5164_v13 = vsub.f32 %v4667_v20, %v5981_v29  ;;  %3663 = vmatprep.mubr.f32.mxu1 %v1497_v41  ;;  %v5848_v56 = vand.u32 4294901760, %v5151_v12  ;;  %v5983_v14 = vand.u32 4294901760, %v5130_v24  ;;  %v5173_v31 = vsub.f32 %v1346_v61, %v5154_v8  ;;  %4003 = vmatprep.subr.bf16.mxu0 %v5079_v15 }
  0x35   :  { %5980 = vst [vmem:[#allocation42_spill] sm:$0xff] %v5159_v19  ;;  %3327 = vmatprep.mubr.f32.mxu0 %v5982_v50  ;;  %4195 = vmatprep.subr.bf16.mxu1 %v5079_v15  ;;  %v4006_v20 = vpack.c.bf16 %v359_v2, %v352_v32  ;;  %v5847_v46 = vand.u32 4294901760, %v5159_v19  ;;  %v5985_v57 = vand.u32 4294901760, %v4672_v21  ;;  %v5986_v61 = vand.u32 4294901760, %v5048_v60 }
  0x36   :  { %v234_v6 = vsub.f32 %v5130_v24, %v5983_v14  ;;  %5984 = vst [vmem:[#allocation43_spill] sm:$0xff] %v5173_v31  ;;  %v5849_v22 = vand.u32 4294901760, %v5164_v13  ;;  %v30_v14 = vld [vmem:[%s5759_s0 + $0x60] sm:$0xff]  ;;  %3664 = vmatmul.mubr.f32.gmra.mrb[6].mxu1 %v1507_v62  ;;  %v1526_v2 = vsub.f32 %v5151_v12, %v5848_v56  ;;  %v5852_v29 = vand.u32 4294901760, %v5173_v31 }
  0x37   :  { %v5182_v41 = vsub.f32 %v4672_v21, %v5985_v57  ;;  %3328 = vmatmul.mubr.f32.gmra.mrb[6].mxu0 %v5986_v61  ;;  %v1347_v50 = vmul.f32 %v29_v51, %v29_v51  ;;  %4197 = vmatpush3.bf16.msra.mxu1 %v5079_v15  ;;  %v244_v21 = vsub.f32 %v5159_v19, %v5847_v46  ;;  %v5202_v57 = vand.u32 4294901760, %v30_v14 }
  0x38   :  { %v235_v32 = vand.u32 4294901760, %v234_v6  ;;  %4005 = vmatpush3.bf16.msra.mxu0 %v5079_v15  ;;  %v365_v60 = vsub.f32 %v5164_v13, %v5849_v22  ;;  %3330 = vmatprep.mubr.f32.mxu0 %v215_v18  ;;  %v1527_v6 = vand.u32 4294901760, %v1526_v2  ;;  %v1536_v51 = vsub.f32 %v5173_v31, %v5852_v29  ;;  %v31_v18 = vld [vmem:[%s5759_s0 + $0x68] sm:$0xff] }
  0x39   :  { %v5853_v62 = vand.u32 4294901760, %v5182_v41  ;;  %5987 = vst [vmem:[#allocation44_spill] sm:$0xff] %v5202_v57  ;;  %3666 = vmatprep.mubr.f32.mxu1 %v1517_v35  ;;  %v5207_v15 = vand.u32 4294901760, %v1347_v50  ;;  %v1348_v61 = vmul.f32 %v30_v14, %v30_v14  ;;  %4007 = vmatprep.subr.bf16.mxu0 %v4006_v20  ;;  %v245_v46 = vand.u32 4294901760, %v244_v21 }
  0x3a   :  { %4199 = vmatprep.subr.bf16.mxu1 %v4006_v20  ;;  %v366_v56 = vand.u32 4294901760, %v365_v60  ;;  %v5213_v19 = vsub.f32 %v30_v14, %v5202_v57  ;;  %3667 = vmatmul.mubr.f32.gmra.mrb[8].mxu1 %v1527_v6  ;;  %v1537_v35 = vand.u32 4294901760, %v1536_v51  ;;  %v5223_v21 = vand.u32 4294901760, %v31_v18 }
  0x3b   :  { %5988 = vst [vmem:[#allocation45_spill] sm:$0xff] %v5207_v15  ;;  %v372_v22 = vsub.f32 %v5182_v41, %v5853_v62  ;;  %3331 = vmatmul.mubr.f32.gmra.mrb[8].mxu0 %v225_v3  ;;  %v5219_v2 = vsub.f32 %v1347_v50, %v5207_v15  ;;  %v5221_v29 = vand.u32 4294901760, %v1348_v61  ;;  %4201 = vmatpush3.bf16.msra.mxu1 %v4006_v20  ;;  %v5993_v62 = vand.u32 4294901760, %v4691_v26 }
  0x3c   :  { %5989 = vst [vmem:[#allocation46_spill] sm:$0xff] %v5213_v19  ;;  %5992 = vst [vmem:[#allocation49_spill] sm:$0xff] %v5223_v21  ;;  %4009 = vmatpush3.bf16.msra.mxu0 %v4006_v20  ;;  %v5994_v3 = vand.u32 4294901760, %v4696_v27  ;;  %3333 = vmatprep.mubr.f32.mxu0 %v235_v32  ;;  %v5241_v20 = vsub.f32 %v31_v18, %v5223_v21 }
  0x3d   :  { %5990 = vst [vmem:[#allocation47_spill] sm:$0xff] %v5219_v2  ;;  %5991 = vst [vmem:[#allocation48_spill] sm:$0xff] %v5221_v29  ;;  %v373_v60 = vand.u32 4294901760, %v372_v22  ;;  %v5229_v31 = vsub.f32 %v4691_v26, %v5993_v62  ;;  %3669 = vmatprep.mubr.f32.mxu1 %v1537_v35  ;;  %v5858_v50 = vand.u32 4294901760, %v5219_v2  ;;  %v5238_v51 = vsub.f32 %v1348_v61, %v5221_v29 }
  0x3e   :  { %v5234_v6 = vsub.f32 %v4696_v27, %v5994_v3  ;;  %5996 = vst [vmem:[#allocation51_spill] sm:$0xff] %v5241_v20  ;;  %v1349_v22 = vmul.f32 %v31_v18, %v31_v18  ;;  %v5997_v26 = vand.u32 4294901760, %v5213_v19 }
  0x3f   :  { %5995 = vst [vmem:[#allocation50_spill] sm:$0xff] %v5238_v51  ;;  %v4010_v14 = vpack.c.bf16 %v373_v60, %v366_v56  ;;  %v5863_v12 = vand.u32 4294901760, %v5229_v31  ;;  %3334 = vmatmul.mubr.f32.gmra.mrb[10].mxu0 %v245_v46  ;;  %v1546_v32 = vsub.f32 %v5219_v2, %v5858_v50  ;;  %v5867_v61 = vand.u32 4294901760, %v5238_v51  ;;  %v32_v56 = vld [vmem:[%s5759_s0 + $0x70] sm:$0xff] }
  0x40   :  { %v254_v62 = vsub.f32 %v5213_v19, %v5997_v26  ;;  %v5866_v27 = vand.u32 4294901760, %v5234_v6  ;;  %v5253_v3 = vand.u32 4294901760, %v1349_v22  ;;  %v5264_v26 = vand.u32 4294901760, %v32_v56 }
  0x41   :  { %4011 = vmatprep.subr.bf16.mxu0 %v4010_v14  ;;  %4203 = vmatprep.subr.bf16.mxu1 %v4010_v14  ;;  %v379_v46 = vsub.f32 %v5229_v31, %v5863_v12  ;;  %v1547_v50 = vand.u32 4294901760, %v1546_v32  ;;  %v1556_v35 = vsub.f32 %v5238_v51, %v5867_v61  ;;  %v6000_v2 = vand.u32 4294901760, %v5241_v20 }
  0x42   :  { %5998 = vst [vmem:[#allocation52_spill] sm:$0xff] %v5253_v3  ;;  %v255_v18 = vand.u32 4294901760, %v254_v62  ;;  %v386_v60 = vsub.f32 %v5234_v6, %v5866_v27  ;;  %5999 = vst [vmem:[#allocation53_spill] sm:$0xff] %v5264_v26  ;;  %4013 = vmatpush3.bf16.msra.mxu0 %v4010_v14  ;;  %4205 = vmatpush3.bf16.msra.mxu1 %v4010_v14  ;;  %v5273_v19 = vsub.f32 %v1349_v22, %v5253_v3  ;;  %v33_v14 = vld [vmem:[%s5759_s0 + $0x78] sm:$0xff] }
  0x43   :  { %v264_v62 = vsub.f32 %v5241_v20, %v6000_v2  ;;  %v380_v12 = vand.u32 4294901760, %v379_v46  ;;  %v5276_v27 = vsub.f32 %v32_v56, %v5264_v26  ;;  %v1350_v32 = vmul.f32 %v32_v56, %v32_v56  ;;  %3670 = vmatmul.mubr.f32.gmra.mrb[10].mxu1 %v1547_v50 }
  0x44   :  { %6001 = vst [vmem:[#allocation54_spill] sm:$0xff] %v5273_v19  ;;  %3336 = vmatprep.mubr.f32.mxu0 %v255_v18  ;;  %v387_v24 = vand.u32 4294901760, %v386_v60  ;;  %v1557_v61 = vand.u32 4294901760, %v1556_v35  ;;  %v5872_v4 = vand.u32 4294901760, %v5273_v19  ;;  %v5282_v2 = vand.u32 4294901760, %v33_v14 }
  0x45   :  { %6002 = vst [vmem:[#allocation55_spill] sm:$0xff] %v5276_v27  ;;  %v265_v51 = vand.u32 4294901760, %v264_v62  ;;  %v5879_v18 = vand.u32 4294901760, %v5276_v27  ;;  %v5285_v46 = vand.u32 4294901760, %v1350_v32  ;;  %v6005_v60 = vand.u32 4294901760, %v4701_v28 }
  0x46   :  { %6003 = vst [vmem:[#allocation56_spill] sm:$0xff] %v5282_v2  ;;  %v4014_v22 = vpack.c.bf16 %v387_v24, %v380_v12  ;;  %3672 = vmatprep.mubr.f32.mxu1 %v1557_v61  ;;  %v1566_v50 = vsub.f32 %v5273_v19, %v5872_v4  ;;  %v5296_v35 = vsub.f32 %v33_v14, %v5282_v2  ;;  %v6007_v12 = vand.u32 4294901760, %v4717_v33 }
  0x47   :  { %6004 = vst [vmem:[#allocation57_spill] sm:$0xff] %v5285_v46  ;;  %v5290_v56 = vsub.f32 %v4701_v28, %v6005_v60  ;;  %3337 = vmatmul.mubr.f32.gmra.mrb[12].mxu0 %v265_v51  ;;  %v274_v28 = vsub.f32 %v5276_v27, %v5879_v18  ;;  %v5307_v51 = vsub.f32 %v1350_v32, %v5285_v46 }
  0x48   :  { %6006 = vst [vmem:[#allocation58_spill] sm:$0xff] %v5296_v35  ;;  %v5301_v24 = vsub.f32 %v4717_v33, %v6007_v12  ;;  %4015 = vmatprep.subr.bf16.mxu0 %v4014_v22  ;;  %4207 = vmatprep.subr.bf16.mxu1 %v4014_v22  ;;  %v1351_v62 = vmul.f32 %v33_v14, %v33_v14  ;;  %v1567_v60 = vand.u32 4294901760, %v1566_v50  ;;  %v5886_v4 = vand.u32 4294901760, %v5296_v35 }
  0x49   :  { %v392_v61 = vand.u32 4294901760, %v5290_v56  ;;  %4017 = vmatpush3.bf16.msra.mxu0 %v4014_v22  ;;  %4209 = vmatpush3.bf16.msra.mxu1 %v4014_v22  ;;  %v275_v12 = vand.u32 4294901760, %v274_v28  ;;  %v5891_v19 = vand.u32 4294901760, %v5307_v51  ;;  %v4022_v3 = vpack.c.bf16 %v4767_v48, %v4765_v47 }
  0x4a   :  { %v399_v33 = vand.u32 4294901760, %v5301_v24  ;;  %v5314_v2 = vand.u32 4294901760, %v1351_v62  ;;  %3673 = vmatmul.mubr.f32.gmra.mrb[12].mxu1 %v1567_v60  ;;  %v284_v32 = vsub.f32 %v5296_v35, %v5886_v4  ;;  %v6010_v35 = vand.u32 4294901760, %v4767_v48 }
  0x4b   :  { %v393_v20 = vsub.f32 %v5290_v56, %v392_v61  ;;  %3339 = vmatprep.mubr.f32.mxu0 %v275_v12  ;;  %v1576_v22 = vsub.f32 %v5307_v51, %v5891_v19  ;;  %v6009_v12 = vand.u32 4294901760, %v4765_v47  ;;  %v6015_v48 = vand.u32 4294901760, %v4988_v17 }
  0x4c   :  { %6008 = vst [vmem:[#allocation59_spill] sm:$0xff] %v5314_v2  ;;  %v400_v14 = vsub.f32 %v5301_v24, %v399_v33  ;;  %v5324_v28 = vsub.f32 %v1351_v62, %v5314_v2  ;;  %v285_v18 = vand.u32 4294901760, %v284_v32  ;;  %v6012_v62 = vand.u32 4294901760, %v4855_v44 }
  0x4d   :  { %v394_v50 = vand.u32 4294901760, %v393_v20  ;;  %v1577_v46 = vand.u32 4294901760, %v1576_v22  ;;  %v5333_v26 = vpack.c.bf16 %v6010_v35, %v6009_v12  ;;  %v6011_v20 = vand.u32 4294901760, %v4841_v1 }
  0x4e   :  { %v401_v27 = vand.u32 4294901760, %v400_v14  ;;  %v5892_v60 = vand.u32 4294901760, %v5324_v28  ;;  %3340 = vmatmul.mubr.f32.gmra.mrb[14].mxu0 %v285_v18  ;;  %v6013_v14 = vand.u32 4294901760, %v4907_v34  ;;  %v6014_v22 = vand.u32 4294901760, %v4924_v10 }
  0x4f   :  { %v5339_v32 = vpack.c.bf16 %v6012_v62, %v6011_v20  ;;  %3675 = vmatprep.mubr.f32.mxu1 %v1577_v46  ;;  %3374 = vmatprep.mubr.f32.mxu0 %v4732_v38  ;;  %v6017_v35 = vand.u32 4294901760, %v5073_v53  ;;  %v6019_v46 = vand.u32 4294901760, %v5164_v13  ;;  %v6020_v20 = vand.u32 4294901760, %v5182_v41 }
  0x50   :  { %v4018_v4 = vpack.c.bf16 %v401_v27, %v394_v50  ;;  %v5345_v19 = vpack.c.bf16 %v6014_v22, %v6013_v14  ;;  %v1586_v47 = vsub.f32 %v5324_v28, %v5892_v60  ;;  %v6016_v27 = vand.u32 4294901760, %v4998_v9 }
  0x51   :  { %v6018_v50 = vand.u32 4294901760, %v5100_v16  ;;  %v5367_v62 = vpack.c.bf16 %v6020_v20, %v6019_v46  ;;  %v6021_v14 = vand.u32 4294901760, %v5229_v31  ;;  %v6022_v22 = vand.u32 4294901760, %v5234_v6  ;;  %v6038_v46 = vld [vmem:[#allocation7_spill] sm:$0xff]  ;;  %v6039_v20 = vld [vmem:[#allocation22_spill] sm:$0xff] }
  0x52   :  { %v5355_v18 = vpack.c.bf16 %v6016_v27, %v6015_v48  ;;  %4019 = vmatprep.subr.bf16.mxu0 %v4018_v4  ;;  %4211 = vmatprep.subr.bf16.mxu1 %v4018_v4  ;;  %v5375_v27 = vpack.c.bf16 %v399_v33, %v392_v61  ;;  %v1587_v60 = vand.u32 4294901760, %v1586_v47  ;;  %v4030_v61 = vpack.c.bf16 %v4924_v10, %v4907_v34  ;;  %v6023_v10 = vld [vmem:[#allocation53_spill] sm:$0xff]  ;;  %v6034_v33 = vld [vmem:[#allocation18_spill] sm:$0xff]  ;;  %v6036_v47 = vld [vmem:[#allocation20_spill] sm:$0xff] }
  0x53   :  { %v5361_v12 = vpack.c.bf16 %v6018_v50, %v6017_v35  ;;  %v5373_v48 = vpack.c.bf16 %v6022_v22, %v6021_v14  ;;  %4021 = vmatpush3.bf16.msra.mxu0 %v4018_v4  ;;  %4213 = vmatpush3.bf16.msra.mxu1 %v4018_v4  ;;  %v4026_v35 = vpack.c.bf16 %v4855_v44, %v4841_v1  ;;  %v6037_v50 = vld [vmem:[#allocation21_spill] sm:$0xff]  ;;  %v6040_v14 = vld [vmem:[#allocation23_spill] sm:$0xff]  ;;  %v6041_v22 = vld [vmem:[#allocation24_spill] sm:$0xff] }
  0x54   :  { %4023 = vmatprep.subr.bf16.mxu0 %v4022_v3  ;;  %4215 = vmatprep.subr.bf16.mxu1 %v4022_v3  ;;  %v4034_v1 = vpack.c.bf16 %v4998_v9, %v4988_v17  ;;  %v4038_v4 = vpack.c.bf16 %v5100_v16, %v5073_v53  ;;  %v4042_v17 = vpack.c.bf16 %v5182_v41, %v5164_v13  ;;  %v6024_v9 = vld [vmem:[#allocation52_spill] sm:$0xff]  ;;  %v6025_v53 = vld [vmem:[#allocation57_spill] sm:$0xff]  ;;  %v6029_v41 = vld [vmem:[#allocation15_spill] sm:$0xff] }
  0x55   :  { %3676 = vmatmul.mubr.f32.gmra.mrb[14].mxu1 %v1587_v60  ;;  %v4046_v44 = vpack.c.bf16 %v5234_v6, %v5229_v31  ;;  %v4050_v34 = vpack.c.bf16 %v5301_v24, %v5290_v56  ;;  %v6026_v16 = vld [vmem:[#allocation56_spill] sm:$0xff]  ;;  %v6027_v13 = vld [vmem:[#allocation13_spill] sm:$0xff]  ;;  %v6030_v6 = vld [vmem:[#allocation14_spill] sm:$0xff] }
  0x56   :  { %3710 = vmatprep.mubr.f32.mxu1 %v4769_v49  ;;  %3375 = vmatmul.mubr.f32.vlgmr.msra.gmra.mrb[0].mxu0 %v4751_v43  ;;  %v6028_v31 = vld [vmem:[#allocation5_spill] sm:$0xff]  ;;  %v6033_v24 = vld [vmem:[#allocation6_spill] sm:$0xff]  ;;  %v6035_v60 = vld [vmem:[#allocation19_spill] sm:$0xff] }
  0x57   :  { %4025 = vmatpush3.bf16.msra.mxu0 %v4022_v3  ;;  %3377 = vmatprep.mubr.f32.mxu0 %v4774_v52  ;;  %v6032_v56 = vld [vmem:[#allocation17_spill] sm:$0xff] }
  0x58   :  { %4027 = vmatprep.subr.bf16.mxu0 %v4026_v35 }
  0x59   :  { %3711 = vmatmul.mubr.f32.vlgmr.msra.gmra.mrb[0].mxu1 %v4787_v59 }
  0x5a   :  { %4217 = vmatpush3.bf16.msra.mxu1 %v4022_v3  ;;  %3713 = vmatprep.mubr.f32.mxu1 %v4801_v0  ;;  %v6031_v3 = vld [vmem:[#allocation16_spill] sm:$0xff] }
  0x5b   :  { %3378 = vmatmul.mubr.f32.gmra.mrb[2].mxu0 %v4836_v54  ;;  %4219 = vmatprep.subr.bf16.mxu1 %v4026_v35 }
  0x5c   :  { %4029 = vmatpush3.bf16.msra.mxu0 %v4026_v35  ;;  %3380 = vmatprep.mubr.f32.mxu0 %v4872_v36 }
  0x5d   :  { %3714 = vmatmul.mubr.f32.gmra.mrb[2].mxu1 %v4879_v30  ;;  %4031 = vmatprep.subr.bf16.mxu0 %v4030_v61 }
  0x5e   :  { %4221 = vmatpush3.bf16.msra.mxu1 %v4026_v35  ;;  %3716 = vmatprep.mubr.f32.mxu1 %v4890_v63  ;;  %v6042_v35 = vld [vmem:[#allocation25_spill] sm:$0xff] }
  0x5f   :  { %3381 = vmatmul.mubr.f32.gmra.mrb[4].mxu0 %v4892_v42  ;;  %4223 = vmatprep.subr.bf16.mxu1 %v4030_v61 }
  0x60   :  { %4033 = vmatpush3.bf16.msra.mxu0 %v4030_v61  ;;  %3383 = vmatprep.mubr.f32.mxu0 %v4962_v25 }
  0x61   :  { %3717 = vmatmul.mubr.f32.gmra.mrb[4].mxu1 %v4968_v55  ;;  %4035 = vmatprep.subr.bf16.mxu0 %v4034_v1 }
  0x62   :  { %4225 = vmatpush3.bf16.msra.mxu1 %v4030_v61  ;;  %3719 = vmatprep.mubr.f32.mxu1 %v4993_v7  ;;  %v6043_v61 = vld [vmem:[#allocation8_spill] sm:$0xff] }
  0x63   :  { %3384 = vmatmul.mubr.f32.gmra.mrb[6].mxu0 %v4983_v40  ;;  %4227 = vmatprep.subr.bf16.mxu1 %v4034_v1 }
  0x64   :  { %4037 = vmatpush3.bf16.msra.mxu0 %v4034_v1  ;;  %3386 = vmatprep.mubr.f32.mxu0 %v5032_v58  ;;  %v6068_v58 = vand.u32 4294901760, %v6031_v3 }
  0x65   :  { %3720 = vmatmul.mubr.f32.gmra.mrb[6].mxu1 %v5016_v23  ;;  %4039 = vmatprep.subr.bf16.mxu0 %v4038_v4  ;;  %v6066_v23 = vand.u32 4294901760, %v6029_v41 }
  0x66   :  { %4229 = vmatpush3.bf16.msra.mxu1 %v4034_v1  ;;  %3722 = vmatprep.mubr.f32.mxu1 %v5084_v45  ;;  %v6044_v1 = vld [vmem:[#allocation27_spill] sm:$0xff]  ;;  %v6063_v45 = vld [vmem:[#allocation12_spill] sm:$0xff] }
  0x67   :  { %3387 = vmatmul.mubr.f32.gmra.mrb[8].mxu0 %v5068_v39  ;;  %4231 = vmatprep.subr.bf16.mxu1 %v4038_v4  ;;  %v6062_v39 = vld [vmem:[#allocation54_spill] sm:$0xff] }
  0x68   :  { %4041 = vmatpush3.bf16.msra.mxu0 %v4038_v4  ;;  %3389 = vmatprep.mubr.f32.mxu0 %v5112_v5  ;;  %v6061_v5 = vld [vmem:[#allocation55_spill] sm:$0xff] }
  0x69   :  { %3723 = vmatmul.mubr.f32.gmra.mrb[8].mxu1 %v5127_v11  ;;  %4043 = vmatprep.subr.bf16.mxu0 %v4042_v17  ;;  %v6060_v11 = vld [vmem:[#allocation51_spill] sm:$0xff] }
  0x6a   :  { %4233 = vmatpush3.bf16.msra.mxu1 %v4038_v4  ;;  %3725 = vmatprep.mubr.f32.mxu1 %v5154_v8  ;;  %v6045_v4 = vld [vmem:[#allocation26_spill] sm:$0xff] }
  0x6b   :  { %3390 = vmatmul.mubr.f32.gmra.mrb[10].mxu0 %v5143_v37  ;;  %4235 = vmatprep.subr.bf16.mxu1 %v4042_v17  ;;  %v6058_v37 = vld [vmem:[#allocation11_spill] sm:$0xff]  ;;  %v6059_v8 = vld [vmem:[#allocation50_spill] sm:$0xff] }
  0x6c   :  { %4045 = vmatpush3.bf16.msra.mxu0 %v4042_v17  ;;  %3392 = vmatprep.mubr.f32.mxu0 %v5202_v57  ;;  %v6057_v57 = vld [vmem:[#allocation47_spill] sm:$0xff] }
  0x6d   :  { %3726 = vmatmul.mubr.f32.gmra.mrb[10].mxu1 %v5207_v15  ;;  %4047 = vmatprep.subr.bf16.mxu0 %v4046_v44  ;;  %v6056_v15 = vld [vmem:[#allocation46_spill] sm:$0xff] }
  0x6e   :  { %4237 = vmatpush3.bf16.msra.mxu1 %v4042_v17  ;;  %3728 = vmatprep.mubr.f32.mxu1 %v5221_v29  ;;  %v6046_v17 = vld [vmem:[#allocation31_spill] sm:$0xff]  ;;  %v6055_v29 = vld [vmem:[#allocation42_spill] sm:$0xff] }
  0x6f   :  { %3393 = vmatmul.mubr.f32.gmra.mrb[12].mxu0 %v5223_v21  ;;  %4239 = vmatprep.subr.bf16.mxu1 %v4046_v44  ;;  %v6054_v21 = vld [vmem:[#allocation43_spill] sm:$0xff] }
  0x70   :  { %4049 = vmatpush3.bf16.msra.mxu0 %v4046_v44  ;;  %3395 = vmatprep.mubr.f32.mxu0 %v6023_v10  ;;  %v6053_v10 = vld [vmem:[#allocation10_spill] sm:$0xff] }
  0x71   :  { %3729 = vmatmul.mubr.f32.gmra.mrb[12].mxu1 %v6024_v9  ;;  %4051 = vmatprep.subr.bf16.mxu0 %v4050_v34  ;;  %v6052_v9 = vld [vmem:[#allocation40_spill] sm:$0xff] }
  0x72   :  { %4241 = vmatpush3.bf16.msra.mxu1 %v4046_v44  ;;  %3731 = vmatprep.mubr.f32.mxu1 %v6025_v53  ;;  %v6047_v44 = vld [vmem:[#allocation30_spill] sm:$0xff] }
  0x73   :  { %3396 = vmatmul.mubr.f32.gmra.mrb[14].mxu0 %v6026_v16  ;;  %4243 = vmatprep.subr.bf16.mxu1 %v4050_v34  ;;  %v6050_v16 = vld [vmem:[#allocation34_spill] sm:$0xff] }
  0x74   :  { %4053 = vmatpush3.bf16.msra.mxu0 %v4050_v34  ;;  %3430 = vmatprep.mubr.f32.mxu0 %v6027_v13  ;;  %v6051_v53 = vld [vmem:[#allocation38_spill] sm:$0xff] }
  0x75   :  { %3732 = vmatmul.mubr.f32.gmra.mrb[14].mxu1 %v5314_v2  ;;  %4055 = vmatprep.subr.bf16.mxu0 %v6028_v31  ;;  %v6049_v2 = vld [vmem:[#allocation35_spill] sm:$0xff] }
  0x76   :  { %4245 = vmatpush3.bf16.msra.mxu1 %v4050_v34  ;;  %3766 = vmatprep.mubr.f32.mxu1 %v6029_v41  ;;  %v6048_v34 = vld [vmem:[#allocation9_spill] sm:$0xff]  ;;  %v6075_v41 = vand.u32 4294901760, %v6040_v14 }
  0x77   :  { %3431 = vmatmul.mubr.f32.vlgmr.msra.gmra.mrb[0].mxu0 %v6030_v6  ;;  %4247 = vmatprep.subr.bf16.mxu1 %v6028_v31 }
  0x78   :  { %4057 = vmatpush3.bf16.msra.mxu0 %v6028_v31  ;;  %3433 = vmatprep.mubr.f32.mxu0 %v6031_v3  ;;  %v6077_v3 = vand.u32 4294901760, %v6042_v35 }
  0x79   :  { %3767 = vmatmul.mubr.f32.vlgmr.msra.gmra.mrb[0].mxu1 %v6032_v56  ;;  %4059 = vmatprep.subr.bf16.mxu0 %v6033_v24 }
  0x7a   :  { %4249 = vmatpush3.bf16.msra.mxu1 %v6028_v31  ;;  %3769 = vmatprep.mubr.f32.mxu1 %v6034_v33 }
  0x7b   :  { %3434 = vmatmul.mubr.f32.gmra.mrb[2].mxu0 %v6035_v60  ;;  %4251 = vmatprep.subr.bf16.mxu1 %v6033_v24 }
  0x7c   :  { %4061 = vmatpush3.bf16.msra.mxu0 %v6033_v24  ;;  %3436 = vmatprep.mubr.f32.mxu0 %v6036_v47 }
  0x7d   :  { %3770 = vmatmul.mubr.f32.gmra.mrb[2].mxu1 %v6037_v50  ;;  %4063 = vmatprep.subr.bf16.mxu0 %v6038_v46 }
  0x7e   :  { %4253 = vmatpush3.bf16.msra.mxu1 %v6033_v24  ;;  %3772 = vmatprep.mubr.f32.mxu1 %v6039_v20 }
  0x7f   :  { %3437 = vmatmul.mubr.f32.gmra.mrb[4].mxu0 %v6040_v14  ;;  %4255 = vmatprep.subr.bf16.mxu1 %v6038_v46  ;;  %v6108_v14 = vld [vmem:[#allocation45_spill] sm:$0xff] }
  0x80   :  { %4065 = vmatpush3.bf16.msra.mxu0 %v6038_v46  ;;  %3439 = vmatprep.mubr.f32.mxu0 %v6041_v22 }
  0x81   :  { %3773 = vmatmul.mubr.f32.gmra.mrb[4].mxu1 %v6042_v35  ;;  %4067 = vmatprep.subr.bf16.mxu0 %v6043_v61  ;;  %v6110_v35 = vld [vmem:[#allocation48_spill] sm:$0xff] }
  0x82   :  { %4257 = vmatpush3.bf16.msra.mxu1 %v6038_v46  ;;  %3775 = vmatprep.mubr.f32.mxu1 %v6044_v1 }
  0x83   :  { %3440 = vmatmul.mubr.f32.gmra.mrb[6].mxu0 %v6045_v4  ;;  %4259 = vmatprep.subr.bf16.mxu1 %v6043_v61 }
  0x84   :  { %4069 = vmatpush3.bf16.msra.mxu0 %v6043_v61  ;;  %3442 = vmatprep.mubr.f32.mxu0 %v6046_v17 }
  0x85   :  { %3776 = vmatmul.mubr.f32.gmra.mrb[6].mxu1 %v6047_v44  ;;  %4071 = vmatprep.subr.bf16.mxu0 %v6048_v34 }
  0x86   :  { %4261 = vmatpush3.bf16.msra.mxu1 %v6043_v61  ;;  %3778 = vmatprep.mubr.f32.mxu1 %v6049_v2 }
  0x87   :  { %3443 = vmatmul.mubr.f32.gmra.mrb[8].mxu0 %v6050_v16  ;;  %4263 = vmatprep.subr.bf16.mxu1 %v6048_v34 }
  0x88   :  { %4073 = vmatpush3.bf16.msra.mxu0 %v6048_v34  ;;  %3445 = vmatprep.mubr.f32.mxu0 %v6051_v53 }
  0x89   :  { %3779 = vmatmul.mubr.f32.gmra.mrb[8].mxu1 %v6052_v9  ;;  %4075 = vmatprep.subr.bf16.mxu0 %v6053_v10 }
  0x8a   :  { %4265 = vmatpush3.bf16.msra.mxu1 %v6048_v34  ;;  %3781 = vmatprep.mubr.f32.mxu1 %v6054_v21  ;;  %v6064_v34 = vld [vmem:[#allocation58_spill] sm:$0xff] }
  0x8b   :  { %3446 = vmatmul.mubr.f32.gmra.mrb[10].mxu0 %v6055_v29  ;;  %4267 = vmatprep.subr.bf16.mxu1 %v6053_v10 }
  0x8c   :  { %4077 = vmatpush3.bf16.msra.mxu0 %v6053_v10  ;;  %3448 = vmatprep.mubr.f32.mxu0 %v6056_v15 }
  0x8d   :  { %3782 = vmatmul.mubr.f32.gmra.mrb[10].mxu1 %v6057_v57  ;;  %4079 = vmatprep.subr.bf16.mxu0 %v6058_v37 }
  0x8e   :  { %4269 = vmatpush3.bf16.msra.mxu1 %v6053_v10  ;;  %3784 = vmatprep.mubr.f32.mxu1 %v6059_v8  ;;  %v6065_v10 = vand.u32 4294901760, %v6027_v13  ;;  %v6070_v13 = vand.u32 4294901760, %v6034_v33  ;;  %v6080_v33 = vand.u32 4294901760, %v6046_v17  ;;  %v6114_v17 = vld [vmem:[#allocation57_spill] sm:$0xff] }
  0x8f   :  { %3449 = vmatmul.mubr.f32.gmra.mrb[12].mxu0 %v6060_v11  ;;  %4271 = vmatprep.subr.bf16.mxu1 %v6058_v37 }
  0x90   :  { %4081 = vmatpush3.bf16.msra.mxu0 %v6058_v37  ;;  %3451 = vmatprep.mubr.f32.mxu0 %v6061_v5 }
  0x91   :  { %3785 = vmatmul.mubr.f32.gmra.mrb[12].mxu1 %v6062_v39  ;;  %4083 = vmatprep.subr.bf16.mxu0 %v6063_v45 }
  0x92   :  { %4273 = vmatpush3.bf16.msra.mxu1 %v6058_v37  ;;  %3787 = vmatprep.mubr.f32.mxu1 %v5307_v51  ;;  %v6067_v37 = vand.u32 4294901760, %v6030_v6  ;;  %v6076_v6 = vand.u32 4294901760, %v6041_v22  ;;  %v6109_v22 = vld [vmem:[#allocation11_spill] sm:$0xff] }
  0x93   :  { %3452 = vmatmul.mubr.f32.gmra.mrb[14].mxu0 %v6064_v34  ;;  %4275 = vmatprep.subr.bf16.mxu1 %v6063_v45 }
  0x94   :  { %4085 = vmatpush3.bf16.msra.mxu0 %v6063_v45  ;;  %3486 = vmatprep.mubr.f32.mxu0 %v6065_v10  ;;  %v6069_v10 = vand.u32 4294901760, %v6032_v56  ;;  %v6079_v56 = vand.u32 4294901760, %v6045_v4  ;;  %v6113_v4 = vld [vmem:[#allocation52_spill] sm:$0xff] }
  0x95   :  { %3788 = vmatmul.mubr.f32.gmra.mrb[14].mxu1 %v5324_v28  ;;  %4087 = vmatprep.subr.bf16.mxu0 %v5333_v26 }
  0x96   :  { %4277 = vmatpush3.bf16.msra.mxu1 %v6063_v45  ;;  %3822 = vmatprep.mubr.f32.mxu1 %v6066_v23  ;;  %v6071_v23 = vand.u32 4294901760, %v6035_v60  ;;  %v6081_v60 = vand.u32 4294901760, %v6047_v44  ;;  %v6115_v44 = vld [vmem:[#allocation56_spill] sm:$0xff] }
  0x97   :  { %3487 = vmatmul.mubr.f32.vlgmr.msra.gmra.mrb[0].mxu0 %v6067_v37  ;;  %4279 = vmatprep.subr.bf16.mxu1 %v5333_v26  ;;  %v6072_v37 = vand.u32 4294901760, %v6036_v47  ;;  %v6083_v47 = vand.u32 4294901760, %v6050_v16  ;;  %v6104_v16 = vld [vmem:[#allocation10_spill] sm:$0xff] }
  0x98   :  { %4089 = vmatpush3.bf16.msra.mxu0 %v5333_v26  ;;  %3489 = vmatprep.mubr.f32.mxu0 %v6068_v58  ;;  %v6073_v58 = vand.u32 4294901760, %v6037_v50  ;;  %v6084_v50 = vand.u32 4294901760, %v6051_v53  ;;  %v6088_v53 = vand.u32 4294901760, %v6056_v15  ;;  %v6092_v15 = vand.u32 4294901760, %v6061_v5 }
  0x99   :  { %3823 = vmatmul.mubr.f32.vlgmr.msra.gmra.mrb[0].mxu1 %v6069_v10  ;;  %4091 = vmatprep.subr.bf16.mxu0 %v5339_v32  ;;  %v6096_v5 = vand.u32 4294901760, %v5324_v28  ;;  %v6099_v28 = vld [vmem:[#allocation9_spill] sm:$0xff] }
  0x9a   :  { %4281 = vmatpush3.bf16.msra.mxu1 %v5333_v26  ;;  %3825 = vmatprep.mubr.f32.mxu1 %v6070_v13  ;;  %v6074_v26 = vand.u32 4294901760, %v6039_v20  ;;  %v6085_v20 = vand.u32 4294901760, %v6052_v9  ;;  %v6089_v9 = vand.u32 4294901760, %v6057_v57  ;;  %v6093_v57 = vand.u32 4294901760, %v6062_v39  ;;  %v6097_v39 = vld [vmem:[#allocation29_spill] sm:$0xff] }
  0x9b   :  { %3490 = vmatmul.mubr.f32.gmra.mrb[2].mxu0 %v6071_v23  ;;  %4283 = vmatprep.subr.bf16.mxu1 %v5339_v32 }
  0x9c   :  { %4093 = vmatpush3.bf16.msra.mxu0 %v5339_v32  ;;  %3492 = vmatprep.mubr.f32.mxu0 %v6072_v37 }
  0x9d   :  { %3826 = vmatmul.mubr.f32.gmra.mrb[2].mxu1 %v6073_v58  ;;  %4095 = vmatprep.subr.bf16.mxu0 %v5345_v19 }
  0x9e   :  { %4285 = vmatpush3.bf16.msra.mxu1 %v5339_v32  ;;  %3828 = vmatprep.mubr.f32.mxu1 %v6074_v26  ;;  %v6078_v32 = vand.u32 4294901760, %v6044_v1  ;;  %v6112_v1 = vld [vmem:[#allocation53_spill] sm:$0xff] }
  0x9f   :  { %3493 = vmatmul.mubr.f32.gmra.mrb[4].mxu0 %v6075_v41  ;;  %4287 = vmatprep.subr.bf16.mxu1 %v5345_v19 }
  0xa0   :  { %4097 = vmatpush3.bf16.msra.mxu0 %v5345_v19  ;;  %3495 = vmatprep.mubr.f32.mxu0 %v6076_v6 }
  0xa1   :  { %3829 = vmatmul.mubr.f32.gmra.mrb[4].mxu1 %v6077_v3  ;;  %4099 = vmatprep.subr.bf16.mxu0 %v5355_v18 }
  0xa2   :  { %4289 = vmatpush3.bf16.msra.mxu1 %v5345_v19  ;;  %3831 = vmatprep.mubr.f32.mxu1 %v6078_v32  ;;  %v6082_v19 = vand.u32 4294901760, %v6049_v2  ;;  %v6086_v2 = vand.u32 4294901760, %v6054_v21  ;;  %v6090_v21 = vand.u32 4294901760, %v6059_v8  ;;  %v6094_v8 = vand.u32 4294901760, %v5307_v51  ;;  %v6098_v51 = vld [vmem:[#allocation28_spill] sm:$0xff] }
  0xa3   :  { %3496 = vmatmul.mubr.f32.gmra.mrb[6].mxu0 %v6079_v56  ;;  %4291 = vmatprep.subr.bf16.mxu1 %v5355_v18 }
  0xa4   :  { %4101 = vmatpush3.bf16.msra.mxu0 %v5355_v18  ;;  %3498 = vmatprep.mubr.f32.mxu0 %v6080_v33 }
  0xa5   :  { %3832 = vmatmul.mubr.f32.gmra.mrb[6].mxu1 %v6081_v60  ;;  %4103 = vmatprep.subr.bf16.mxu0 %v5361_v12 }
  0xa6   :  { %4293 = vmatpush3.bf16.msra.mxu1 %v5355_v18  ;;  %3834 = vmatprep.mubr.f32.mxu1 %v6082_v19  ;;  %v6087_v18 = vand.u32 4294901760, %v6055_v29  ;;  %v6091_v29 = vand.u32 4294901760, %v6060_v11  ;;  %v6095_v11 = vand.u32 4294901760, %v6064_v34  ;;  %v6116_v34 = vld [vmem:[#allocation59_spill] sm:$0xff] }
  0xa7   :  { %3499 = vmatmul.mubr.f32.gmra.mrb[8].mxu0 %v6083_v47  ;;  %4295 = vmatprep.subr.bf16.mxu1 %v5361_v12 }
  0xa8   :  { %4105 = vmatpush3.bf16.msra.mxu0 %v5361_v12  ;;  %3501 = vmatprep.mubr.f32.mxu0 %v6084_v50 }
  0xa9   :  { %3835 = vmatmul.mubr.f32.gmra.mrb[8].mxu1 %v6085_v20  ;;  %4107 = vmatprep.subr.bf16.mxu0 %v5367_v62 }
  0xaa   :  { %4297 = vmatpush3.bf16.msra.mxu1 %v5361_v12  ;;  %3837 = vmatprep.mubr.f32.mxu1 %v6086_v2  ;;  %v6100_v12 = vld [vmem:[#allocation33_spill] sm:$0xff] }
  0xab   :  { %3502 = vmatmul.mubr.f32.gmra.mrb[10].mxu0 %v6087_v18  ;;  %4299 = vmatprep.subr.bf16.mxu1 %v5367_v62 }
  0xac   :  { %4109 = vmatpush3.bf16.msra.mxu0 %v5367_v62  ;;  %3504 = vmatprep.mubr.f32.mxu0 %v6088_v53 }
  0xad   :  { %3838 = vmatmul.mubr.f32.gmra.mrb[10].mxu1 %v6089_v9  ;;  %4111 = vmatprep.subr.bf16.mxu0 %v5373_v48 }
  0xae   :  { %4301 = vmatpush3.bf16.msra.mxu1 %v5367_v62  ;;  %3840 = vmatprep.mubr.f32.mxu1 %v6090_v21  ;;  %v6101_v62 = vld [vmem:[#allocation32_spill] sm:$0xff] }
  0xaf   :  { %3505 = vmatmul.mubr.f32.gmra.mrb[12].mxu0 %v6091_v29  ;;  %4303 = vmatprep.subr.bf16.mxu1 %v5373_v48 }
  0xb0   :  { %4113 = vmatpush3.bf16.msra.mxu0 %v5373_v48  ;;  %3507 = vmatprep.mubr.f32.mxu0 %v6092_v15 }
  0xb1   :  { %3841 = vmatmul.mubr.f32.gmra.mrb[12].mxu1 %v6093_v57  ;;  %4115 = vmatprep.subr.bf16.mxu0 %v5375_v27 }
  0xb2   :  { %4305 = vmatpush3.bf16.msra.mxu1 %v5373_v48  ;;  %3843 = vmatprep.mubr.f32.mxu1 %v6094_v8  ;;  %v6102_v48 = vld [vmem:[#allocation36_spill] sm:$0xff] }
  0xb3   :  { %3508 = vmatmul.mubr.f32.gmra.mrb[14].mxu0 %v6095_v11  ;;  %4307 = vmatprep.subr.bf16.mxu1 %v5375_v27 }
  0xb4   :  { %4117 = vmatpush3.bf16.msra.mxu0 %v5375_v27  ;;  %3542 = vmatprep.mubr.f32.mxu0 %v4732_v38 }
  0xb5   :  { %3844 = vmatmul.mubr.f32.gmra.mrb[14].mxu1 %v6096_v5  ;;  %4119 = vmatprep.subr.bf16.mxu0 %v6028_v31 }
  0xb6   :  { %4309 = vmatpush3.bf16.msra.mxu1 %v5375_v27  ;;  %3878 = vmatprep.mubr.f32.mxu1 %v4769_v49  ;;  %v6103_v27 = vld [vmem:[#allocation37_spill] sm:$0xff] }
  0xb7   :  { %3543 = vmatmul.mubr.f32.vlgmr.msra.gmra.mrb[0].mxu0 %v4751_v43  ;;  %4311 = vmatprep.subr.bf16.mxu1 %v6028_v31 }
  0xb8   :  { %4121 = vmatpush3.bf16.msra.mxu0 %v6028_v31  ;;  %3545 = vmatprep.mubr.f32.mxu0 %v4774_v52 }
  0xb9   :  { %3879 = vmatmul.mubr.f32.vlgmr.msra.gmra.mrb[0].mxu1 %v4787_v59  ;;  %4123 = vmatprep.subr.bf16.mxu0 %v6033_v24 }
  0xba   :  { %4313 = vmatpush3.bf16.msra.mxu1 %v6028_v31  ;;  %3881 = vmatprep.mubr.f32.mxu1 %v4801_v0  ;;  %v6105_v31 = vld [vmem:[#allocation41_spill] sm:$0xff] }
  0xbb   :  { %3546 = vmatmul.mubr.f32.gmra.mrb[2].mxu0 %v4836_v54  ;;  %4315 = vmatprep.subr.bf16.mxu1 %v6033_v24 }
  0xbc   :  { %4125 = vmatpush3.bf16.msra.mxu0 %v6033_v24  ;;  %3548 = vmatprep.mubr.f32.mxu0 %v4872_v36 }
  0xbd   :  { %3882 = vmatmul.mubr.f32.gmra.mrb[2].mxu1 %v4879_v30  ;;  %4127 = vmatprep.subr.bf16.mxu0 %v6038_v46 }
  0xbe   :  { %4317 = vmatpush3.bf16.msra.mxu1 %v6033_v24  ;;  %3884 = vmatprep.mubr.f32.mxu1 %v4890_v63  ;;  %v6106_v24 = vld [vmem:[#allocation39_spill] sm:$0xff] }
  0xbf   :  { %3549 = vmatmul.mubr.f32.gmra.mrb[4].mxu0 %v4892_v42  ;;  %4319 = vmatprep.subr.bf16.mxu1 %v6038_v46 }
  0xc0   :  { %4129 = vmatpush3.bf16.msra.mxu0 %v6038_v46  ;;  %3551 = vmatprep.mubr.f32.mxu0 %v4962_v25 }
  0xc1   :  { %3885 = vmatmul.mubr.f32.gmra.mrb[4].mxu1 %v4968_v55  ;;  %4131 = vmatprep.subr.bf16.mxu0 %v6043_v61 }
  0xc2   :  { %4321 = vmatpush3.bf16.msra.mxu1 %v6038_v46  ;;  %3887 = vmatprep.mubr.f32.mxu1 %v4993_v7  ;;  %v6107_v46 = vld [vmem:[#allocation44_spill] sm:$0xff] }
  0xc3   :  { %3552 = vmatmul.mubr.f32.gmra.mrb[6].mxu0 %v4983_v40  ;;  %4323 = vmatprep.subr.bf16.mxu1 %v6043_v61 }
  0xc4   :  { %4133 = vmatpush3.bf16.msra.mxu0 %v6043_v61  ;;  %3554 = vmatprep.mubr.f32.mxu0 %v6097_v39 }
  0xc5   :  { %3888 = vmatmul.mubr.f32.gmra.mrb[6].mxu1 %v6098_v51  ;;  %4135 = vmatprep.subr.bf16.mxu0 %v6099_v28 }
  0xc6   :  { %4325 = vmatpush3.bf16.msra.mxu1 %v6043_v61  ;;  %3890 = vmatprep.mubr.f32.mxu1 %v6100_v12  ;;  %v6111_v61 = vld [vmem:[#allocation49_spill] sm:$0xff] }
  0xc7   :  { %3555 = vmatmul.mubr.f32.gmra.mrb[8].mxu0 %v6101_v62  ;;  %4327 = vmatprep.subr.bf16.mxu1 %v6099_v28 }
  0xc8   :  { %4137 = vmatpush3.bf16.msra.mxu0 %v6099_v28  ;;  %3557 = vmatprep.mubr.f32.mxu0 %v6102_v48 }
  0xc9   :  { %3891 = vmatmul.mubr.f32.gmra.mrb[8].mxu1 %v6103_v27  ;;  %4139 = vmatprep.subr.bf16.mxu0 %v6104_v16 }
  0xca   :  { %4329 = vmatpush3.bf16.msra.mxu1 %v6099_v28  ;;  %3893 = vmatprep.mubr.f32.mxu1 %v6105_v31 }
  0xcb   :  { %3558 = vmatmul.mubr.f32.gmra.mrb[10].mxu0 %v6106_v24  ;;  %4331 = vmatprep.subr.bf16.mxu1 %v6104_v16 }
  0xcc   :  { %4141 = vmatpush3.bf16.msra.mxu0 %v6104_v16  ;;  %3560 = vmatprep.mubr.f32.mxu0 %v6107_v46 }
  0xcd   :  { %3894 = vmatmul.mubr.f32.gmra.mrb[10].mxu1 %v6108_v14  ;;  %4143 = vmatprep.subr.bf16.mxu0 %v6109_v22 }
  0xce   :  { %4333 = vmatpush3.bf16.msra.mxu1 %v6104_v16  ;;  %3896 = vmatprep.mubr.f32.mxu1 %v6110_v35 }
  0xcf   :  { %3561 = vmatmul.mubr.f32.gmra.mrb[12].mxu0 %v6111_v61  ;;  %4335 = vmatprep.subr.bf16.mxu1 %v6109_v22 }
  0xd0   :  { %4145 = vmatpush3.bf16.msra.mxu0 %v6109_v22  ;;  %3563 = vmatprep.mubr.f32.mxu0 %v6112_v1 }
  0xd1   :  { %3897 = vmatmul.mubr.f32.gmra.mrb[12].mxu1 %v6113_v4  ;;  %4147 = vmatprep.subr.bf16.mxu0 %v6063_v45 }
  0xd2   :  { %4337 = vmatpush3.bf16.msra.mxu1 %v6109_v22  ;;  %3899 = vmatprep.mubr.f32.mxu1 %v6114_v17 }
  0xd3   :  { %3564 = vmatmul.mubr.f32.gmra.mrb[14].mxu0 %v6115_v44  ;;  %4339 = vmatprep.subr.bf16.mxu1 %v6063_v45 }
  0xd4   :  { %4149 = vmatpush3.bf16.msra.mxu0 %v6063_v45  ;;  %3598 = vmatprep.mubr.f32.mxu0 %v4732_v38 }
  0xd5   :  { %3900 = vmatmul.mubr.f32.gmra.mrb[14].mxu1 %v6116_v34 }
  0xd6   :  { %4341 = vmatpush3.bf16.msra.mxu1 %v6063_v45  ;;  %3934 = vmatprep.mubr.f32.mxu1 %v4769_v49 }
  0xd7   :  { %3599 = vmatmul.mubr.f32.vlgmr.msra.gmra.mrb[0].mxu0 %v4751_v43 }
  0xd8   :  { %3601 = vmatprep.mubr.f32.mxu0 %v4774_v52 }
  0xd9   :  { %3935 = vmatmul.mubr.f32.vlgmr.msra.gmra.mrb[0].mxu1 %v4787_v59 }
  0xda   :  { %3937 = vmatprep.mubr.f32.mxu1 %v4801_v0 }
  0xdb   :  { %3602 = vmatmul.mubr.f32.gmra.mrb[2].mxu0 %v4836_v54 }
  0xdc   :  { %3604 = vmatprep.mubr.f32.mxu0 %v4872_v36 }
  0xdd   :  { %3938 = vmatmul.mubr.f32.gmra.mrb[2].mxu1 %v4879_v30  ;;  %v4580_v30 = vmov 0  }
  0xde   :  { %3940 = vmatprep.mubr.f32.mxu1 %v4890_v63  ;;  %4506 = vset.pattern.permute.xlu0 %v4580_v30 }
  0xdf   :  { %3605 = vmatmul.mubr.f32.gmra.mrb[4].mxu0 %v4892_v42  ;;  %4507 = vset.pattern.permute.xlu1 %v4580_v30 }
  0xe0   :  { %3607 = vmatprep.mubr.f32.mxu0 %v4962_v25 }
  0xe1   :  { %3941 = vmatmul.mubr.f32.gmra.mrb[4].mxu1 %v4968_v55 }
  0xe2   :  { %3943 = vmatprep.mubr.f32.mxu1 %v4993_v7 }
  0xe3   :  { %3608 = vmatmul.mubr.f32.gmra.mrb[6].mxu0 %v4983_v40 }
  0xe4   :  { %3610 = vmatprep.mubr.f32.mxu0 %v6097_v39 }
  0xe5   :  { %3944 = vmatmul.mubr.f32.gmra.mrb[6].mxu1 %v6098_v51 }
  0xe6   :  { %3946 = vmatprep.mubr.f32.mxu1 %v6100_v12 }
  0xe7   :  { %3611 = vmatmul.mubr.f32.gmra.mrb[8].mxu0 %v6101_v62 }
  0xe8   :  { %3613 = vmatprep.mubr.f32.mxu0 %v6102_v48 }
  0xe9   :  { %3947 = vmatmul.mubr.f32.gmra.mrb[8].mxu1 %v6103_v27 }
  0xea   :  { %3949 = vmatprep.mubr.f32.mxu1 %v6105_v31 }
  0xeb   :  { %3614 = vmatmul.mubr.f32.gmra.mrb[10].mxu0 %v6106_v24 }
  0xec   :  { %3616 = vmatprep.mubr.f32.mxu0 %v6107_v46 }
  0xed   :  { %3950 = vmatmul.mubr.f32.gmra.mrb[10].mxu1 %v6108_v14 }
  0xee   :  { %3952 = vmatprep.mubr.f32.mxu1 %v6110_v35 }
  0xef   :  { %3617 = vmatmul.mubr.f32.gmra.mrb[12].mxu0 %v6111_v61 }
  0xf0   :  { %3619 = vmatprep.mubr.f32.mxu0 %v6112_v1 }
  0xf1   :  { %3953 = vmatmul.mubr.f32.gmra.mrb[12].mxu1 %v6113_v4 }
  0xf2   :  { %3955 = vmatprep.mubr.f32.mxu1 %v6114_v17 }
  0xf3   :  { %3620 = vmatmul.mubr.f32.gmra.mrb[14].mxu0 %v6115_v44 }
  0xf5   :  { %3956 = vmatmul.mubr.f32.gmra.mrb[14].mxu1 %v6116_v34 }
 0x1aa   :  { %v3600_v36 = vpop.f32.mrb[0].mxu0 }
 0x1ab   :  { %v2639_v38 = vmul.f32 0.0078125, %v3600_v36  ;;  %v1242_v40 = vpop.f32.mrb[1].mxu0 }
 0x1ac   :  { %v3936_v43 = vpop.f32.mrb[0].mxu1  ;;  %v2638_v49 = vmul.f32 0.0078125, %v1242_v40 }
 0x1ad   :  { %v2671_v52 = vmul.f32 %v2639_v38, %v2639_v38  ;;  %v2655_v54 = vmul.f32 0.0078125, %v3936_v43  ;;  %v2544_v59 = vpop.f32.mrb[1].mxu1 }
 0x1ae   :  { %v2670_v0 = vmul.f32 %v2638_v49, %v2638_v49  ;;  %v2654_v63 = vmul.f32 0.0078125, %v2544_v59  ;;  %v3603_v42 = vpop.f32.mrb[2].mxu0 }
 0x1af   :  { %v2687_v55 = vsub.f32 %v2655_v54, %v2671_v52  ;;  %v2641_v25 = vmul.f32 0.0078125, %v3603_v42  ;;  %v1254_v7 = vpop.f32.mrb[3].mxu0 }
 0x1b0   :  { %v2686_v45 = vsub.f32 %v2654_v63, %v2670_v0  ;;  %v3939_v10 = vpop.f32.mrb[2].mxu1  ;;  %v2640_v13 = vmul.f32 0.0078125, %v1254_v7 }
 0x1b1   :  { %v2703_v23 = vmax.f32 %v2687_v55, 0.0  ;;  %v2673_v37 = vmul.f32 %v2641_v25, %v2641_v25  ;;  %v2657_v58 = vmul.f32 0.0078125, %v3939_v10  ;;  %v2556_v26 = vpop.f32.mrb[3].mxu1 }
 0x1b2   :  { %v2702_v41 = vmax.f32 %v2686_v45, 0.0  ;;  %v2672_v6 = vmul.f32 %v2640_v13, %v2640_v13  ;;  %v2656_v3 = vmul.f32 0.0078125, %v2556_v26  ;;  %v3606_v32 = vpop.f32.mrb[4].mxu0 }
 0x1b3   :  { %v2719_v56 = vadd.f32 1e-05, %v2703_v23  ;;  %v2689_v33 = vsub.f32 %v2657_v58, %v2673_v37  ;;  %v2643_v60 = vmul.f32 0.0078125, %v3606_v32  ;;  %v1266_v19 = vpop.f32.mrb[5].mxu0 }
 0x1b4   :  { %v2718_v47 = vadd.f32 1e-05, %v2702_v41  ;;  %v2688_v50 = vsub.f32 %v2656_v3, %v2672_v6  ;;  %v3942_v20 = vpop.f32.mrb[4].mxu1  ;;  %v2642_v2 = vmul.f32 0.0078125, %v1266_v19 }
 0x1b5   :  { %4508 = vrsqrt.f32 %v2719_v56  ;;  %v2705_v18 = vmax.f32 %v2689_v33, 0.0  ;;  %v2675_v53 = vmul.f32 %v2643_v60, %v2643_v60  ;;  %v2659_v9 = vmul.f32 0.0078125, %v3942_v20  ;;  %v2568_v21 = vpop.f32.mrb[5].mxu1 }
 0x1b6   :  { %v2704_v29 = vmax.f32 %v2688_v50, 0.0  ;;  %v2674_v15 = vmul.f32 %v2642_v2, %v2642_v2  ;;  %v2658_v57 = vmul.f32 0.0078125, %v2568_v21  ;;  %v3609_v8 = vpop.f32.mrb[6].mxu0  ;;  %4510 = vrsqrt.f32 %v2718_v47 }
 0x1b7   :  { %v2721_v11 = vadd.f32 1e-05, %v2705_v18  ;;  %v2691_v5 = vsub.f32 %v2659_v9, %v2675_v53  ;;  %v2645_v39 = vmul.f32 0.0078125, %v3609_v8  ;;  %v1278_v51 = vpop.f32.mrb[7].mxu0 }
 0x1b8   :  { %v2720_v28 = vadd.f32 1e-05, %v2704_v29  ;;  %v2690_v12 = vsub.f32 %v2658_v57, %v2674_v15  ;;  %v3945_v62 = vpop.f32.mrb[6].mxu1  ;;  %v2644_v48 = vmul.f32 0.0078125, %v1278_v51 }
 0x1b9   :  { %4512 = vrsqrt.f32 %v2721_v11  ;;  %v2707_v27 = vmax.f32 %v2691_v5, 0.0  ;;  %v2677_v16 = vmul.f32 %v2645_v39, %v2645_v39  ;;  %v2661_v31 = vmul.f32 0.0078125, %v3945_v62  ;;  %v2580_v24 = vpop.f32.mrb[7].mxu1 }
 0x1ba   :  { %v2706_v46 = vmax.f32 %v2690_v12, 0.0  ;;  %v2676_v14 = vmul.f32 %v2644_v48, %v2644_v48  ;;  %v2660_v22 = vmul.f32 0.0078125, %v2580_v24  ;;  %v3612_v35 = vpop.f32.mrb[8].mxu0  ;;  %4514 = vrsqrt.f32 %v2720_v28 }
 0x1bb   :  { %v2693_v61 = vsub.f32 %v2661_v31, %v2677_v16  ;;  %v2647_v1 = vmul.f32 0.0078125, %v3612_v35  ;;  %v1290_v4 = vpop.f32.mrb[9].mxu0  ;;  %v2723_v17 = vadd.f32 1e-05, %v2707_v27 }
 0x1bc   :  { %v2722_v44 = vadd.f32 1e-05, %v2706_v46  ;;  %v2692_v34 = vsub.f32 %v2660_v22, %v2676_v14  ;;  %v3948_v30 = vpop.f32.mrb[8].mxu1  ;;  %v2646_v36 = vmul.f32 0.0078125, %v1290_v4 }
 0x1bd   :  { %v2709_v38 = vmax.f32 %v2693_v61, 0.0  ;;  %v2679_v40 = vmul.f32 %v2647_v1, %v2647_v1  ;;  %v2663_v43 = vmul.f32 0.0078125, %v3948_v30  ;;  %v2592_v49 = vpop.f32.mrb[9].mxu1 }
 0x1be   :  { %4516 = vrsqrt.f32 %v2722_v44  ;;  %v2708_v52 = vmax.f32 %v2692_v34, 0.0  ;;  %v2678_v54 = vmul.f32 %v2646_v36, %v2646_v36  ;;  %v2662_v59 = vmul.f32 0.0078125, %v2592_v49  ;;  %v3615_v0 = vpop.f32.mrb[10].mxu0 }
 0x1bf   :  { %v4509_v63 = vpop.eup %4508  ;;  %v2695_v42 = vsub.f32 %v2663_v43, %v2679_v40  ;;  %v2649_v55 = vmul.f32 0.0078125, %v3615_v0  ;;  %v1302_v25 = vpop.f32.mrb[11].mxu0  ;;  %4518 = vrsqrt.f32 %v2723_v17  ;;  %v2725_v23 = vadd.f32 1e-05, %v2709_v38 }
 0x1c0   :  { %v2724_v7 = vadd.f32 1e-05, %v2708_v52  ;;  %v2694_v45 = vsub.f32 %v2662_v59, %v2678_v54  ;;  %v3951_v10 = vpop.f32.mrb[10].mxu1  ;;  %v2648_v13 = vmul.f32 0.0078125, %v1302_v25  ;;  %2757 = vperm.xlu0 %4506, %v4509_v63   ;;  %v4511_v6 = vpop.eup %4510 }
 0x1c1   :  { %v2711_v37 = vmax.f32 %v2695_v42, 0.0  ;;  %v2681_v58 = vmul.f32 %v2649_v55, %v2649_v55  ;;  %v2665_v26 = vmul.f32 0.0078125, %v3951_v10  ;;  %v2604_v41 = vpop.f32.mrb[11].mxu1 }
 0x1c2   :  { %4520 = vrsqrt.f32 %v2724_v7  ;;  %v2710_v3 = vmax.f32 %v2694_v45, 0.0  ;;  %v2680_v32 = vmul.f32 %v2648_v13, %v2648_v13  ;;  %v2664_v56 = vmul.f32 0.0078125, %v2604_v41  ;;  %v3618_v33 = vpop.f32.mrb[12].mxu0  ;;  %v5681_v13 = vld [vmem:[%s5762_s3] ss:$0 sm:$0xff] }
 0x1c3   :  { %v4513_v60 = vpop.eup %4512  ;;  %v2697_v19 = vsub.f32 %v2665_v26, %v2681_v58  ;;  %v2651_v47 = vmul.f32 0.0078125, %v3618_v33  ;;  %v1314_v50 = vpop.f32.mrb[13].mxu0  ;;  %v2727_v20 = vadd.f32 1e-05, %v2711_v37  ;;  %4522 = vrsqrt.f32 %v2725_v23  ;;  %v4540_v37 = vld [vmem:[%s5759_s0 + $0x8] sm:$0xff] }
 0x1c4   :  { %v2726_v2 = vadd.f32 1e-05, %v2710_v3  ;;  %v2696_v18 = vsub.f32 %v2664_v56, %v2680_v32  ;;  %v3954_v53 = vpop.f32.mrb[12].mxu1  ;;  %v2650_v9 = vmul.f32 0.0078125, %v1314_v50  ;;  %2752 = vperm.xlu0 %4506, %v4511_v6   ;;  %2767 = vperm.xlu1 %4507, %v4513_v60   ;;  %v4515_v51 = vpop.eup %4514  ;;  %v4541_v3 = vld [vmem:[%s5759_s0] sm:$0xff]  ;;  %v4542_v56 = vld [vmem:[%s5759_s0 + $0x18] sm:$0xff] }
 0x1c5   :  { %v2713_v21 = vmax.f32 %v2697_v19, 0.0  ;;  %v2683_v29 = vmul.f32 %v2651_v47, %v2651_v47  ;;  %v2667_v15 = vmul.f32 0.0078125, %v3954_v53  ;;  %v2616_v57 = vpop.f32.mrb[13].mxu1  ;;  %v4543_v50 = vld [vmem:[%s5759_s0 + $0x10] sm:$0xff] }
 0x1c6   :  { %4524 = vrsqrt.f32 %v2726_v2  ;;  %v2712_v8 = vmax.f32 %v2696_v18, 0.0  ;;  %v2682_v11 = vmul.f32 %v2650_v9, %v2650_v9  ;;  %v2666_v5 = vmul.f32 0.0078125, %v2616_v57  ;;  %v3621_v39 = vpop.f32.mrb[14].mxu0  ;;  %v4544_v18 = vld [vmem:[%s5759_s0 + $0x20] sm:$0xff] }
 0x1c7   :  { %v2699_v28 = vsub.f32 %v2667_v15, %v2683_v29  ;;  %v2653_v12 = vmul.f32 0.0078125, %v3621_v39  ;;  %v1326_v62 = vpop.f32.mrb[15].mxu0  ;;  %4526 = vrsqrt.f32 %v2727_v20  ;;  %v2729_v46 = vadd.f32 1e-05, %v2713_v21  ;;  %v4545_v15 = vld [vmem:[%s5759_s0 + $0x28] sm:$0xff] }
 0x1c8   :  { %v4517_v48 = vpop.eup %4516  ;;  %v2728_v27 = vadd.f32 1e-05, %v2712_v8  ;;  %v2698_v16 = vsub.f32 %v2666_v5, %v2682_v11  ;;  %v3957_v31 = vpop.f32.mrb[14].mxu1  ;;  %v2652_v24 = vmul.f32 0.0078125, %v1326_v62  ;;  %2762 = vperm.xlu1 %4507, %v4515_v51   ;;  %v4546_v11 = vld [vmem:[%s5759_s0 + $0x30] sm:$0xff] }
 0x1c9   :  { %v2715_v14 = vmax.f32 %v2699_v28, 0.0  ;;  %v2685_v22 = vmul.f32 %v2653_v12, %v2653_v12  ;;  %v2669_v35 = vmul.f32 0.0078125, %v3957_v31  ;;  %v2628_v61 = vpop.f32.mrb[15].mxu1  ;;  %2772 = vperm.xlu0 %4506, %v4517_v48   ;;  %v4519_v1 = vpop.eup %4518  ;;  %v4547_v12 = vld [vmem:[%s5759_s0 + $0x38] sm:$0xff] }
 0x1ca   :  { %4528 = vrsqrt.f32 %v2728_v27  ;;  %v2714_v4 = vmax.f32 %v2698_v16, 0.0  ;;  %v2684_v17 = vmul.f32 %v2652_v24, %v2652_v24  ;;  %v2668_v44 = vmul.f32 0.0078125, %v2628_v61  ;;  %v4548_v27 = vld [vmem:[%s5759_s0 + $0x40] sm:$0xff]  ;;  %v4550_v61 = vld [vmem:[%s5759_s0 + $0x50] sm:$0xff] }
 0x1cb   :  { %v2701_v34 = vsub.f32 %v2669_v35, %v2685_v22  ;;  %4530 = vrsqrt.f32 %v2729_v46  ;;  %v2731_v40 = vadd.f32 1e-05, %v2715_v14  ;;  %v4549_v14 = vld [vmem:[%s5759_s0 + $0x48] sm:$0xff] }
 0x1cc   :  { %v4521_v30 = vpop.eup %4520  ;;  %v2730_v36 = vadd.f32 1e-05, %v2714_v4  ;;  %v2700_v38 = vsub.f32 %v2668_v44, %v2684_v17  ;;  %2777 = vperm.xlu1 %4507, %v4519_v1  }
 0x1cd   :  { %v2717_v43 = vmax.f32 %v2701_v34, 0.0  ;;  %2782 = vperm.xlu0 %4506, %v4521_v30   ;;  %v4523_v52 = vpop.eup %4522  ;;  %v4551_v34 = vld [vmem:[%s5759_s0 + $0x58] sm:$0xff] }
 0x1ce   :  { %4532 = vrsqrt.f32 %v2730_v36  ;;  %v2716_v49 = vmax.f32 %v2700_v38, 0.0  ;;  %v4552_v38 = vld [vmem:[%s5759_s0 + $0x60] sm:$0xff] }
 0x1cf   :  { %4534 = vrsqrt.f32 %v2731_v40  ;;  %v2733_v0 = vadd.f32 1e-05, %v2717_v43 }
 0x1d0   :  { %v4525_v54 = vpop.eup %4524  ;;  %v2732_v59 = vadd.f32 1e-05, %v2716_v49  ;;  %2787 = vperm.xlu1 %4507, %v4523_v52  }
 0x1d1   :  { %2792 = vperm.xlu0 %4506, %v4525_v54   ;;  %v4527_v63 = vpop.eup %4526  ;;  %v4553_v54 = vld [vmem:[%s5759_s0 + $0x68] sm:$0xff] }
 0x1d2   :  { %4536 = vrsqrt.f32 %v2732_v59 }
 0x1d3   :  { %4538 = vrsqrt.f32 %v2733_v0 }
 0x1d4   :  { %v4529_v42 = vpop.eup %4528  ;;  %2797 = vperm.xlu1 %4507, %v4527_v63   ;;  %v4554_v63 = vld [vmem:[%s5759_s0 + $0x70] sm:$0xff] }
 0x1d5   :  { %2802 = vperm.xlu0 %4506, %v4529_v42   ;;  %v4531_v55 = vpop.eup %4530 }
 0x1d8   :  { %v4533_v25 = vpop.eup %4532  ;;  %2807 = vperm.xlu1 %4507, %v4531_v55  }
 0x1d9   :  { %2812 = vperm.xlu0 %4506, %v4533_v25   ;;  %v4535_v7 = vpop.eup %4534 }
 0x1dc   :  { %v4537_v45 = vpop.eup %4536  ;;  %2817 = vperm.xlu1 %4507, %v4535_v7  }
 0x1dd   :  { %2822 = vperm.xlu0 %4506, %v4537_v45   ;;  %v4539_v10 = vpop.eup %4538  ;;  %v4555_v45 = vld [vmem:[%s5759_s0 + $0x78] sm:$0xff] }
 0x1e0   :  { %2827 = vperm.xlu1 %4507, %v4539_v10  }
 0x23f   :  { %v2758_v23 = vpop.permute.xlu0 %2757 }
 0x240   :  { %v2831_v58 = vmul.f32 %v4540_v37, %v2758_v23 }
 0x242   :  { %v2854_v26 = vmul.f32 %v5681_v13, %v2831_v58 }
 0x243   :  { %v2753_v41 = vpop.permute.xlu0 %2752  ;;  %v2768_v6 = vpop.permute.xlu1 %2767 }
 0x244   :  { %2870 = vst [vmem:[#allocation2 + $0x8] sm:$0xff] %v2854_v26  ;;  %v2830_v32 = vmul.f32 %v4541_v3, %v2753_v41  ;;  %v2833_v33 = vmul.f32 %v4542_v56, %v2768_v6 }
 0x246   :  { %v2853_v60 = vmul.f32 %v5681_v13, %v2830_v32  ;;  %v2856_v19 = vmul.f32 %v5681_v13, %v2833_v33 }
 0x247   :  { %v2763_v47 = vpop.permute.xlu1 %2762 }
 0x248   :  { %2869 = vst [vmem:[#allocation2] sm:$0xff] %v2853_v60  ;;  %2872 = vst [vmem:[#allocation2 + $0x18] sm:$0xff] %v2856_v19  ;;  %v2832_v20 = vmul.f32 %v4543_v50, %v2763_v47  ;;  %v2773_v2 = vpop.permute.xlu0 %2772 }
 0x249   :  { %v2834_v53 = vmul.f32 %v4544_v18, %v2773_v2 }
 0x24a   :  { %v2855_v9 = vmul.f32 %v5681_v13, %v2832_v20 }
 0x24b   :  { %v2857_v21 = vmul.f32 %v5681_v13, %v2834_v53  ;;  %v2778_v29 = vpop.permute.xlu1 %2777 }
 0x24c   :  { %2871 = vst [vmem:[#allocation2 + $0x10] sm:$0xff] %v2855_v9  ;;  %v2835_v57 = vmul.f32 %v4545_v15, %v2778_v29  ;;  %v2783_v8 = vpop.permute.xlu0 %2782 }
 0x24d   :  { %2873 = vst [vmem:[#allocation2 + $0x20] sm:$0xff] %v2857_v21  ;;  %v2836_v5 = vmul.f32 %v4546_v11, %v2783_v8 }
 0x24e   :  { %v2858_v39 = vmul.f32 %v5681_v13, %v2835_v57 }
 0x24f   :  { %v2859_v51 = vmul.f32 %v5681_v13, %v2836_v5  ;;  %v2788_v28 = vpop.permute.xlu1 %2787 }
 0x250   :  { %2874 = vst [vmem:[#allocation2 + $0x28] sm:$0xff] %v2858_v39  ;;  %v2837_v62 = vmul.f32 %v4547_v12, %v2788_v28  ;;  %v2793_v48 = vpop.permute.xlu0 %2792 }
 0x251   :  { %2875 = vst [vmem:[#allocation2 + $0x30] sm:$0xff] %v2859_v51  ;;  %v2838_v16 = vmul.f32 %v4548_v27, %v2793_v48 }
 0x252   :  { %v2860_v31 = vmul.f32 %v5681_v13, %v2837_v62 }
 0x253   :  { %v2861_v24 = vmul.f32 %v5681_v13, %v2838_v16  ;;  %v2798_v46 = vpop.permute.xlu1 %2797 }
 0x254   :  { %2876 = vst [vmem:[#allocation2 + $0x38] sm:$0xff] %v2860_v31  ;;  %v2839_v22 = vmul.f32 %v4549_v14, %v2798_v46  ;;  %v2803_v35 = vpop.permute.xlu0 %2802 }
 0x255   :  { %2877 = vst [vmem:[#allocation2 + $0x40] sm:$0xff] %v2861_v24  ;;  %v2840_v1 = vmul.f32 %v4550_v61, %v2803_v35 }
 0x256   :  { %v2862_v4 = vmul.f32 %v5681_v13, %v2839_v22 }
 0x257   :  { %v2863_v17 = vmul.f32 %v5681_v13, %v2840_v1  ;;  %v2808_v44 = vpop.permute.xlu1 %2807 }
 0x258   :  { %2878 = vst [vmem:[#allocation2 + $0x48] sm:$0xff] %v2862_v4  ;;  %v2841_v30 = vmul.f32 %v4551_v34, %v2808_v44  ;;  %v2813_v36 = vpop.permute.xlu0 %2812 }
 0x259   :  { %2879 = vst [vmem:[#allocation2 + $0x50] sm:$0xff] %v2863_v17  ;;  %v2842_v40 = vmul.f32 %v4552_v38, %v2813_v36 }
 0x25a   :  { %v2864_v43 = vmul.f32 %v5681_v13, %v2841_v30 }
 0x25b   :  { %v2865_v49 = vmul.f32 %v5681_v13, %v2842_v40  ;;  %v2818_v52 = vpop.permute.xlu1 %2817 }
 0x25c   :  { %2880 = vst [vmem:[#allocation2 + $0x58] sm:$0xff] %v2864_v43  ;;  %v2843_v59 = vmul.f32 %v4553_v54, %v2818_v52  ;;  %v2823_v0 = vpop.permute.xlu0 %2822 }
 0x25d   :  { %2881 = vst [vmem:[#allocation2 + $0x60] sm:$0xff] %v2865_v49  ;;  %v2844_v42 = vmul.f32 %v4554_v63, %v2823_v0 }
 0x25e   :  { %v2866_v55 = vmul.f32 %v5681_v13, %v2843_v59 }
 0x25f   :  { %v2867_v25 = vmul.f32 %v5681_v13, %v2844_v42  ;;  %v2828_v7 = vpop.permute.xlu1 %2827 }
 0x260   :  { %2882 = vst [vmem:[#allocation2 + $0x68] sm:$0xff] %v2866_v55  ;;  %v2845_v10 = vmul.f32 %v4555_v45, %v2828_v7 }
 0x261   :  { %2883 = vst [vmem:[#allocation2 + $0x70] sm:$0xff] %v2867_v25 }
 0x262   :  { %v2868_v23 = vmul.f32 %v5681_v13, %v2845_v10 }
 0x264   :  { %2884 = vst [vmem:[#allocation2 + $0x78] sm:$0xff] %v2868_v23 }
 0x265   :  { %4567 = shalt.err (!%p4564_p4)
}
 0x266   :  { %s4568_s5 = scalar_lea.hbm %s5763_s4, 2048 }
 0x267   :  { %p4569_p5 = scmp.ne.s32.totalorder %s5763_s4, %s4568_s5  ;;  %p4572_p6 = scmp.lt.u32.totalorder %s4568_s5, %s5763_s4 }
 0x269   :  { %p4574_p7 = pnand %p4572_p6, %p4569_p5 }
 0x26b   :  { %4577 = shalt.err (!%p4574_p7)
}
 0x26c   :  { %s4582_s9 = smov 128   ;;  %s4583_s10 = smov 8  }
 0x26d   :  { %2896 = dma.vmem_to_hbm [thread:$0]  %s2891_s26, 2048, %s5763_s4, [#allocation3], %s4582_s9, %s4582_s9, %s4583_s10  }
 0x26e   :  { %4578 = dma.done.wait [#allocation3], 2048  }
 0x26f   :  { %4579 = vsyncadd [#allocation3], 4294965248 }
 0x270   :  { %2900 = vsyncpa [#allocation3], 1 }

</bundles_post_ra>
